<compile_context>
chip_gen: v7x
topology: tpu7x:2x2x1
jax: 0.10.0
libtpu: 0.0.40
codegen_flags: <defaults>
</compile_context>

<pallas_src>
import jax
import jax.numpy as jnp
from jax import lax
from jax.experimental import pallas as pl
from jax.experimental.pallas import tpu as pltpu

HIDDEN_SIZE = 64
INPUT_SIZE = 5
NUM_CLASSES = 1
FC1_SIZE = 128

GATE_PAD = 128        # each gate padded H=64 -> 128 lanes (vreg aligned)
IN_PAD = 8            # input feature dim padded 5 -> 8
BATCH_TILE = 8        # batch tile = one sublane group
OUT_PAD = 128         # head output padded 1 -> 128 lanes (lane-dense store)


def stock_lstm_kernel(
    x_ref,       # (T, BATCH_TILE, IN_PAD)   f32, time-major, zero-padded
    w_ih_ref,    # (IN_PAD, 4*GATE_PAD)      bf16, gate-padded
    w_hh_ref,    # (GATE_PAD, 4*GATE_PAD)    bf16, gate-padded
    b_ref,       # (1, 4*GATE_PAD)           f32, fused b_ih + b_hh
    w1_ref,      # (GATE_PAD, FC1_SIZE)      bf16 (rows >= H are zero)
    b1_ref,      # (1, FC1_SIZE)             f32
    w2_ref,      # (FC1_SIZE, OUT_PAD)       bf16 (cols >= 1 are zero)
    b2_ref,      # (1, OUT_PAD)              f32
    out_ref,     # (BATCH_TILE, OUT_PAD)     f32
    gx_ref,      # (T*BATCH_TILE, 4*GATE_PAD) f32 scratch: x gate terms
):
    T = x_ref.shape[0]
    BT = x_ref.shape[1]
    GP = GATE_PAD

    # Hoist the x contribution of the gates off the serial recurrence:
    # one (T*BT, I) @ (I, 4*GP) bf16 matmul + fused f32 bias.
    x2 = x_ref[...].reshape(T * BT, IN_PAD).astype(jnp.bfloat16)
    gx_ref[...] = (
        jnp.dot(x2, w_ih_ref[...], preferred_element_type=jnp.float32)
        + b_ref[...]
    )

    def step(t, carry):
        h, c = carry
        row = pl.multiple_of(t * BT, BT)
        # Read W_hh from VMEM per matmul (no 64-vreg live value across the
        # unrolled loop); h is cast to bf16 to feed the MXU natively.
        gates = gx_ref[pl.ds(row, BT), :] + jnp.dot(
            h.astype(jnp.bfloat16), w_hh_ref[...],
            preferred_element_type=jnp.float32,
        )  # (BT, 4*GP) f32

        # PyTorch gate order [i, f, g, o]; each gate occupies its own 128-lane
        # block, so these slices are vreg-aligned static selects.
        i_g = jax.nn.sigmoid(gates[:, 0 * GP:1 * GP])
        f_g = jax.nn.sigmoid(gates[:, 1 * GP:2 * GP])
        g_g = jnp.tanh(gates[:, 2 * GP:3 * GP])
        o_g = jax.nn.sigmoid(gates[:, 3 * GP:4 * GP])

        c_new = f_g * c + i_g * g_g        # padded lanes stay exactly zero
        h_new = o_g * jnp.tanh(c_new)      # padded lanes stay exactly zero
        return h_new, c_new

    h0 = jnp.zeros((BT, GP), jnp.float32)
    c0 = jnp.zeros((BT, GP), jnp.float32)
    h, _ = lax.fori_loop(0, T, step, (h0, c0), unroll=min(T, 8))

    # Head: relu -> fc_1 -> relu -> fc.  Padded lanes of h are exactly zero
    # and the matching weight rows/cols are zero, so padding is inert.
    hr = jnp.maximum(h, 0.0).astype(jnp.bfloat16)
    y1 = jnp.dot(hr, w1_ref[...], preferred_element_type=jnp.float32) + b1_ref[...]
    y1 = jnp.maximum(y1, 0.0).astype(jnp.bfloat16)
    y2 = jnp.dot(y1, w2_ref[...], preferred_element_type=jnp.float32) + b2_ref[...]
    out_ref[...] = y2.astype(out_ref.dtype)


def pack_params(raw):
    """Convert raw PyTorch-layout f32 weights into the padded kernel layout."""
    w_ih, w_hh, b_ih, b_hh, w1, b1, w2, b2 = raw
    H, GP = HIDDEN_SIZE, GATE_PAD

    def pad_gates(w_t):  # (n_in, 4H) -> (n_in, 4*GP), each gate -> 128 lanes
        n_in = w_t.shape[0]
        w3 = w_t.reshape(n_in, 4, H)
        w3 = jnp.pad(w3, ((0, 0), (0, 0), (0, GP - H)))
        return w3.reshape(n_in, 4 * GP)

    w_ih_p = pad_gates(w_ih.T)                                        # (I, 4GP)
    w_ih_p = jnp.pad(w_ih_p, ((0, IN_PAD - INPUT_SIZE), (0, 0)))
    w_ih_p = w_ih_p.astype(jnp.bfloat16)                              # (IN_PAD, 4GP)

    w_hh_p = pad_gates(w_hh.T)                                        # (H, 4GP)
    w_hh_p = jnp.pad(w_hh_p, ((0, GP - H), (0, 0))).astype(jnp.bfloat16)

    b = (b_ih + b_hh).reshape(1, 4, H)
    b = jnp.pad(b, ((0, 0), (0, 0), (0, GP - H))).reshape(1, 4 * GP)  # f32

    w1_p = jnp.pad(w1.T, ((0, GP - H), (0, 0))).astype(jnp.bfloat16)  # (GP, FC1)
    b1_p = b1.reshape(1, FC1_SIZE)

    w2_p = jnp.pad(w2.T, ((0, 0), (0, OUT_PAD - NUM_CLASSES)))
    w2_p = w2_p.astype(jnp.bfloat16)                                  # (FC1, OUT_PAD)
    b2_p = jnp.pad(b2.reshape(1, NUM_CLASSES),
                   ((0, 0), (0, OUT_PAD - NUM_CLASSES)))              # (1, OUT_PAD)

    return (w_ih_p, w_hh_p, b, w1_p, b1_p, w2_p, b2_p)


def stock_lstm_forward(x, packed):
    """x: (B, T, INPUT_SIZE) float32 (batch_first). Returns (B, NUM_CLASSES)."""
    B, T, I = x.shape
    assert I == INPUT_SIZE

    BT = BATCH_TILE
    n_btiles = pl.cdiv(B, BT)
    Bp = n_btiles * BT

    # Time-major, zero-pad batch (to a tile multiple) and features.
    x_tm = jnp.transpose(x, (1, 0, 2))                                # (T, B, I)
    x_tm = jnp.pad(x_tm, ((0, 0), (0, Bp - B), (0, IN_PAD - I)))      # (T, Bp, IN_PAD)

    w_ih_p, w_hh_p, b_p, w1_p, b1_p, w2_p, b2_p = packed

    out = pl.pallas_call(
        stock_lstm_kernel,
        out_shape=jax.ShapeDtypeStruct((Bp, OUT_PAD), jnp.float32),
        grid_spec=pltpu.PrefetchScalarGridSpec(
            num_scalar_prefetch=0,
            grid=(n_btiles,),
            in_specs=[
                pl.BlockSpec((T, BT, IN_PAD), lambda b: (0, b, 0)),
                # Weights / biases: full blocks, constant index maps (DMA'd once,
                # not refetched per batch tile).
                pl.BlockSpec(w_ih_p.shape, lambda b: (0, 0)),
                pl.BlockSpec(w_hh_p.shape, lambda b: (0, 0)),
                pl.BlockSpec(b_p.shape, lambda b: (0, 0)),
                pl.BlockSpec(w1_p.shape, lambda b: (0, 0)),
                pl.BlockSpec(b1_p.shape, lambda b: (0, 0)),
                pl.BlockSpec(w2_p.shape, lambda b: (0, 0)),
                pl.BlockSpec(b2_p.shape, lambda b: (0, 0)),
            ],
            out_specs=pl.BlockSpec((BT, OUT_PAD), lambda b: (b, 0)),
            scratch_shapes=[
                pltpu.VMEM((T * BT, 4 * GATE_PAD), jnp.float32),
            ],
        ),
        compiler_params=pltpu.CompilerParams(
            dimension_semantics=("parallel",)),
    )(x_tm, *packed)
    return out[:B, :NUM_CLASSES]


def init_params(key):
    """Raw PyTorch-shaped f32 weights (uniform(-1/sqrt(fan_in), 1/sqrt(fan_in)))."""
    H, I, C = HIDDEN_SIZE, INPUT_SIZE, NUM_CLASSES
    ks = jax.random.split(key, 8)
    lim = 1.0 / jnp.sqrt(jnp.float32(H))
    u = lambda k, shape, l: jax.random.uniform(k, shape, jnp.float32, -l, l)

    w_ih = u(ks[0], (4 * H, I), lim)        # weight_ih_l0
    w_hh = u(ks[1], (4 * H, H), lim)        # weight_hh_l0
    b_ih = u(ks[2], (4 * H,), lim)
    b_hh = u(ks[3], (4 * H,), lim)
    w1 = u(ks[4], (FC1_SIZE, H), lim)       # fc_1.weight
    b1 = u(ks[5], (FC1_SIZE,), lim)
    lim2 = 1.0 / jnp.sqrt(jnp.float32(FC1_SIZE))
    w2 = u(ks[6], (C, FC1_SIZE), lim2)      # fc.weight
    b2 = u(ks[7], (C,), lim2)
    return (w_ih, w_hh, b_ih, b_hh, w1, b1, w2, b2)


def reference_forward(x, raw):
    """Pure-JAX f32 reference with the raw (unpadded) weights."""
    w_ih, w_hh, b_ih, b_hh, w1, b1, w2, b2 = raw
    B, T, _ = x.shape
    H = HIDDEN_SIZE
    hp = jax.lax.Precision.HIGHEST
    h = jnp.zeros((B, H), jnp.float32)
    c = jnp.zeros((B, H), jnp.float32)
    for t in range(T):
        g = (jnp.dot(x[:, t, :], w_ih.T, precision=hp)
             + jnp.dot(h, w_hh.T, precision=hp)
             + b_ih + b_hh)
        i_g = jax.nn.sigmoid(g[:, 0 * H:1 * H])
        f_g = jax.nn.sigmoid(g[:, 1 * H:2 * H])
        g_g = jnp.tanh(g[:, 2 * H:3 * H])
        o_g = jax.nn.sigmoid(g[:, 3 * H:4 * H])
        c = f_g * c + i_g * g_g
        h = o_g * jnp.tanh(c)
    y = jnp.maximum(h, 0.0)
    y = jnp.maximum(jnp.dot(y, w1.T, precision=hp) + b1, 0.0)
    return jnp.dot(y, w2.T, precision=hp) + b2


if __name__ == "__main__":
    key = jax.random.PRNGKey(0)
    k_x, k_p = jax.random.split(key)

    B, T = 2, 8
    x = jax.random.normal(k_x, (B, T, INPUT_SIZE), jnp.float32)
    raw = init_params(k_p)
    packed = pack_params(raw)

    out = stock_lstm_forward(x, packed)
    out = jax.block_until_ready(out)

    ref = reference_forward(x, raw)
    assert out.shape == (B, NUM_CLASSES)
    # bf16 matmul operands compound small rounding error through the T-step
    # recurrence; tolerance loosened accordingly vs the f32 reference.
    assert jnp.allclose(out, ref, atol=3e-2, rtol=3e-2), (out, ref)

    print("KERNEL_OK")
</pallas_src>

<mosaic_0001>
module attributes {stable_mosaic.version = 11 : i64} {
  func.func @stock_lstm_kernel(%arg0: i32, %arg1: memref<8x8x8xf32, #tpu.memory_space<vmem>>, %arg2: memref<8x512xbf16, #tpu.memory_space<vmem>>, %arg3: memref<128x512xbf16, #tpu.memory_space<vmem>>, %arg4: memref<1x512xf32, #tpu.memory_space<vmem>>, %arg5: memref<128x128xbf16, #tpu.memory_space<vmem>>, %arg6: memref<1x128xf32, #tpu.memory_space<vmem>>, %arg7: memref<128x128xbf16, #tpu.memory_space<vmem>>, %arg8: memref<1x128xf32, #tpu.memory_space<vmem>>, %arg9: memref<8x128xf32, #tpu.memory_space<vmem>>, %arg10: memref<64x512xf32, #tpu.memory_space<vmem>>) attributes {dimension_semantics = [#tpu.dimension_semantics<parallel>], iteration_bounds = array<i64: 1>, scalar_prefetch = 0 : i64, scratch_operands = 1 : i64, tpu.core_type = #tpu.core_type<tc>, window_params = [{transform_indices = @transform_0, window_bounds = array<i64: 8, 8, 8>}, {pipeline_mode = #tpu.pipeline_mode<synchronous>, transform_indices = @transform_1, window_bounds = array<i64: 8, 512>}, {pipeline_mode = #tpu.pipeline_mode<synchronous>, transform_indices = @transform_2, window_bounds = array<i64: 128, 512>}, {pipeline_mode = #tpu.pipeline_mode<synchronous>, transform_indices = @transform_3, window_bounds = array<i64: 1, 512>}, {pipeline_mode = #tpu.pipeline_mode<synchronous>, transform_indices = @transform_4, window_bounds = array<i64: 128, 128>}, {pipeline_mode = #tpu.pipeline_mode<synchronous>, transform_indices = @transform_5, window_bounds = array<i64: 1, 128>}, {pipeline_mode = #tpu.pipeline_mode<synchronous>, transform_indices = @transform_6, window_bounds = array<i64: 128, 128>}, {pipeline_mode = #tpu.pipeline_mode<synchronous>, transform_indices = @transform_7, window_bounds = array<i64: 1, 128>}, {transform_indices = @transform_8, window_bounds = array<i64: 8, 128>}]} {
    %c0 = arith.constant 0 : index
    %c0_0 = arith.constant 0 : index
    %c0_1 = arith.constant 0 : index
    %0 = vector.load %arg1[%c0, %c0_0, %c0_1] : memref<8x8x8xf32, #tpu.memory_space<vmem>>, vector<8x8x8xf32>
    %1 = vector.shape_cast %0 : vector<8x8x8xf32> to vector<64x8xf32>
    %2 = arith.truncf %1 : vector<64x8xf32> to vector<64x8xbf16>
    %c0_2 = arith.constant 0 : index
    %c0_3 = arith.constant 0 : index
    %3 = vector.load %arg2[%c0_2, %c0_3] : memref<8x512xbf16, #tpu.memory_space<vmem>>, vector<8x512xbf16>
    %cst = arith.constant dense<0.000000e+00> : vector<64x512xf32>
    %4 = tpu.matmul %2, %3, %cst {dimension_numbers = #tpu.dot_dimension_numbers<[1], [0], [0], [1], [0, 0, 1, 1], [], []>} : vector<64x8xbf16>, vector<8x512xbf16>, vector<64x512xf32> -> vector<64x512xf32>
    %c0_4 = arith.constant 0 : index
    %c0_5 = arith.constant 0 : index
    %5 = vector.load %arg4[%c0_4, %c0_5] : memref<1x512xf32, #tpu.memory_space<vmem>>, vector<1x512xf32>
    %6 = vector.broadcast %5 : vector<1x512xf32> to vector<64x512xf32>
    %7 = arith.addf %4, %6 : vector<64x512xf32>
    %c0_6 = arith.constant 0 : index
    %c0_7 = arith.constant 0 : index
    %8 = vector.load %arg10[%c0_6, %c0_7] : memref<64x512xf32, #tpu.memory_space<vmem>>, vector<64x512xf32>
    tpu.vector_store %arg10[%c0_6, %c0_7], %7 {strides = array<i32>} : memref<64x512xf32, #tpu.memory_space<vmem>>, vector<64x512xf32>,
    %cst_8 = arith.constant 0.000000e+00 : f32
    %9 = vector.broadcast %cst_8 : f32 to vector<8x128xf32>
    %cst_9 = arith.constant 0.000000e+00 : f32
    %10 = vector.broadcast %cst_9 : f32 to vector<8x128xf32>
    %c0_i32 = arith.constant 0 : i32
    %c8_i32 = arith.constant 8 : i32
    %11 = arith.muli %c0_i32, %c8_i32 : i32
    %12 = tpu.assume_multiple %11, 8 : i32
    %13 = arith.index_cast %12 : i32 to index
    %c0_10 = arith.constant 0 : index
    %14 = vector.load %arg10[%13, %c0_10] : memref<64x512xf32, #tpu.memory_space<vmem>>, vector<8x512xf32>
    %15 = arith.truncf %9 : vector<8x128xf32> to vector<8x128xbf16>
    %c0_11 = arith.constant 0 : index
    %c0_12 = arith.constant 0 : index
    %16 = vector.load %arg3[%c0_11, %c0_12] : memref<128x512xbf16, #tpu.memory_space<vmem>>, vector<128x512xbf16>
    %cst_13 = arith.constant dense<0.000000e+00> : vector<8x512xf32>
    %17 = tpu.matmul %15, %16, %cst_13 {dimension_numbers = #tpu.dot_dimension_numbers<[1], [0], [0], [1], [0, 0, 1, 1], [], []>} : vector<8x128xbf16>, vector<128x512xbf16>, vector<8x512xf32> -> vector<8x512xf32>
    %18 = arith.addf %14, %17 : vector<8x512xf32>
    %19 = vector.extract_strided_slice %18 {offsets = [0, 0], sizes = [8, 128], strides = [1, 1]} : vector<8x512xf32> to vector<8x128xf32>
    %20 = arith.negf %19 : vector<8x128xf32>
    %21 = math.exp %20 : vector<8x128xf32>
    %cst_14 = arith.constant 1.000000e+00 : f32
    %22 = vector.broadcast %cst_14 : f32 to vector<8x128xf32>
    %23 = arith.addf %22, %21 : vector<8x128xf32>
    %24 = arith.divf %22, %23 : vector<8x128xf32>
    %25 = vector.extract_strided_slice %18 {offsets = [0, 128], sizes = [8, 128], strides = [1, 1]} : vector<8x512xf32> to vector<8x128xf32>
    %26 = arith.negf %25 : vector<8x128xf32>
    %27 = math.exp %26 : vector<8x128xf32>
    %cst_15 = arith.constant 1.000000e+00 : f32
    %28 = vector.broadcast %cst_15 : f32 to vector<8x128xf32>
    %29 = arith.addf %28, %27 : vector<8x128xf32>
    %30 = arith.divf %28, %29 : vector<8x128xf32>
    %31 = vector.extract_strided_slice %18 {offsets = [0, 256], sizes = [8, 128], strides = [1, 1]} : vector<8x512xf32> to vector<8x128xf32>
    %32 = math.tanh %31 : vector<8x128xf32>
    %33 = vector.extract_strided_slice %18 {offsets = [0, 384], sizes = [8, 128], strides = [1, 1]} : vector<8x512xf32> to vector<8x128xf32>
    %34 = arith.negf %33 : vector<8x128xf32>
    %35 = math.exp %34 : vector<8x128xf32>
    %cst_16 = arith.constant 1.000000e+00 : f32
    %36 = vector.broadcast %cst_16 : f32 to vector<8x128xf32>
    %37 = arith.addf %36, %35 : vector<8x128xf32>
    %38 = arith.divf %36, %37 : vector<8x128xf32>
    %39 = arith.mulf %30, %10 : vector<8x128xf32>
    %40 = arith.mulf %24, %32 : vector<8x128xf32>
    %41 = arith.addf %39, %40 : vector<8x128xf32>
    %42 = math.tanh %41 : vector<8x128xf32>
    %43 = arith.mulf %38, %42 : vector<8x128xf32>
    %c1_i32 = arith.constant 1 : i32
    %c8_i32_17 = arith.constant 8 : i32
    %44 = arith.muli %c1_i32, %c8_i32_17 : i32
    %45 = tpu.assume_multiple %44, 8 : i32
    %46 = arith.index_cast %45 : i32 to index
    %c0_18 = arith.constant 0 : index
    %47 = vector.load %arg10[%46, %c0_18] : memref<64x512xf32, #tpu.memory_space<vmem>>, vector<8x512xf32>
    %48 = arith.truncf %43 : vector<8x128xf32> to vector<8x128xbf16>
    %c0_19 = arith.constant 0 : index
    %c0_20 = arith.constant 0 : index
    %49 = vector.load %arg3[%c0_19, %c0_20] : memref<128x512xbf16, #tpu.memory_space<vmem>>, vector<128x512xbf16>
    %cst_21 = arith.constant dense<0.000000e+00> : vector<8x512xf32>
    %50 = tpu.matmul %48, %49, %cst_21 {dimension_numbers = #tpu.dot_dimension_numbers<[1], [0], [0], [1], [0, 0, 1, 1], [], []>} : vector<8x128xbf16>, vector<128x512xbf16>, vector<8x512xf32> -> vector<8x512xf32>
    %51 = arith.addf %47, %50 : vector<8x512xf32>
    %52 = vector.extract_strided_slice %51 {offsets = [0, 0], sizes = [8, 128], strides = [1, 1]} : vector<8x512xf32> to vector<8x128xf32>
    %53 = arith.negf %52 : vector<8x128xf32>
    %54 = math.exp %53 : vector<8x128xf32>
    %cst_22 = arith.constant 1.000000e+00 : f32
    %55 = vector.broadcast %cst_22 : f32 to vector<8x128xf32>
    %56 = arith.addf %55, %54 : vector<8x128xf32>
    %57 = arith.divf %55, %56 : vector<8x128xf32>
    %58 = vector.extract_strided_slice %51 {offsets = [0, 128], sizes = [8, 128], strides = [1, 1]} : vector<8x512xf32> to vector<8x128xf32>
    %59 = arith.negf %58 : vector<8x128xf32>
    %60 = math.exp %59 : vector<8x128xf32>
    %cst_23 = arith.constant 1.000000e+00 : f32
    %61 = vector.broadcast %cst_23 : f32 to vector<8x128xf32>
    %62 = arith.addf %61, %60 : vector<8x128xf32>
    %63 = arith.divf %61, %62 : vector<8x128xf32>
    %64 = vector.extract_strided_slice %51 {offsets = [0, 256], sizes = [8, 128], strides = [1, 1]} : vector<8x512xf32> to vector<8x128xf32>
    %65 = math.tanh %64 : vector<8x128xf32>
    %66 = vector.extract_strided_slice %51 {offsets = [0, 384], sizes = [8, 128], strides = [1, 1]} : vector<8x512xf32> to vector<8x128xf32>
    %67 = arith.negf %66 : vector<8x128xf32>
    %68 = math.exp %67 : vector<8x128xf32>
    %cst_24 = arith.constant 1.000000e+00 : f32
    %69 = vector.broadcast %cst_24 : f32 to vector<8x128xf32>
    %70 = arith.addf %69, %68 : vector<8x128xf32>
    %71 = arith.divf %69, %70 : vector<8x128xf32>
    %72 = arith.mulf %63, %41 : vector<8x128xf32>
    %73 = arith.mulf %57, %65 : vector<8x128xf32>
    %74 = arith.addf %72, %73 : vector<8x128xf32>
    %75 = math.tanh %74 : vector<8x128xf32>
    %76 = arith.mulf %71, %75 : vector<8x128xf32>
    %c2_i32 = arith.constant 2 : i32
    %c8_i32_25 = arith.constant 8 : i32
    %77 = arith.muli %c2_i32, %c8_i32_25 : i32
    %78 = tpu.assume_multiple %77, 8 : i32
    %79 = arith.index_cast %78 : i32 to index
    %c0_26 = arith.constant 0 : index
    %80 = vector.load %arg10[%79, %c0_26] : memref<64x512xf32, #tpu.memory_space<vmem>>, vector<8x512xf32>
    %81 = arith.truncf %76 : vector<8x128xf32> to vector<8x128xbf16>
    %c0_27 = arith.constant 0 : index
    %c0_28 = arith.constant 0 : index
    %82 = vector.load %arg3[%c0_27, %c0_28] : memref<128x512xbf16, #tpu.memory_space<vmem>>, vector<128x512xbf16>
    %cst_29 = arith.constant dense<0.000000e+00> : vector<8x512xf32>
    %83 = tpu.matmul %81, %82, %cst_29 {dimension_numbers = #tpu.dot_dimension_numbers<[1], [0], [0], [1], [0, 0, 1, 1], [], []>} : vector<8x128xbf16>, vector<128x512xbf16>, vector<8x512xf32> -> vector<8x512xf32>
    %84 = arith.addf %80, %83 : vector<8x512xf32>
    %85 = vector.extract_strided_slice %84 {offsets = [0, 0], sizes = [8, 128], strides = [1, 1]} : vector<8x512xf32> to vector<8x128xf32>
    %86 = arith.negf %85 : vector<8x128xf32>
    %87 = math.exp %86 : vector<8x128xf32>
    %cst_30 = arith.constant 1.000000e+00 : f32
    %88 = vector.broadcast %cst_30 : f32 to vector<8x128xf32>
    %89 = arith.addf %88, %87 : vector<8x128xf32>
    %90 = arith.divf %88, %89 : vector<8x128xf32>
    %91 = vector.extract_strided_slice %84 {offsets = [0, 128], sizes = [8, 128], strides = [1, 1]} : vector<8x512xf32> to vector<8x128xf32>
    %92 = arith.negf %91 : vector<8x128xf32>
    %93 = math.exp %92 : vector<8x128xf32>
    %cst_31 = arith.constant 1.000000e+00 : f32
    %94 = vector.broadcast %cst_31 : f32 to vector<8x128xf32>
    %95 = arith.addf %94, %93 : vector<8x128xf32>
    %96 = arith.divf %94, %95 : vector<8x128xf32>
    %97 = vector.extract_strided_slice %84 {offsets = [0, 256], sizes = [8, 128], strides = [1, 1]} : vector<8x512xf32> to vector<8x128xf32>
    %98 = math.tanh %97 : vector<8x128xf32>
    %99 = vector.extract_strided_slice %84 {offsets = [0, 384], sizes = [8, 128], strides = [1, 1]} : vector<8x512xf32> to vector<8x128xf32>
    %100 = arith.negf %99 : vector<8x128xf32>
    %101 = math.exp %100 : vector<8x128xf32>
    %cst_32 = arith.constant 1.000000e+00 : f32
    %102 = vector.broadcast %cst_32 : f32 to vector<8x128xf32>
    %103 = arith.addf %102, %101 : vector<8x128xf32>
    %104 = arith.divf %102, %103 : vector<8x128xf32>
    %105 = arith.mulf %96, %74 : vector<8x128xf32>
    %106 = arith.mulf %90, %98 : vector<8x128xf32>
    %107 = arith.addf %105, %106 : vector<8x128xf32>
    %108 = math.tanh %107 : vector<8x128xf32>
    %109 = arith.mulf %104, %108 : vector<8x128xf32>
    %c3_i32 = arith.constant 3 : i32
    %c8_i32_33 = arith.constant 8 : i32
    %110 = arith.muli %c3_i32, %c8_i32_33 : i32
    %111 = tpu.assume_multiple %110, 8 : i32
    %112 = arith.index_cast %111 : i32 to index
    %c0_34 = arith.constant 0 : index
    %113 = vector.load %arg10[%112, %c0_34] : memref<64x512xf32, #tpu.memory_space<vmem>>, vector<8x512xf32>
    %114 = arith.truncf %109 : vector<8x128xf32> to vector<8x128xbf16>
    %c0_35 = arith.constant 0 : index
    %c0_36 = arith.constant 0 : index
    %115 = vector.load %arg3[%c0_35, %c0_36] : memref<128x512xbf16, #tpu.memory_space<vmem>>, vector<128x512xbf16>
    %cst_37 = arith.constant dense<0.000000e+00> : vector<8x512xf32>
    %116 = tpu.matmul %114, %115, %cst_37 {dimension_numbers = #tpu.dot_dimension_numbers<[1], [0], [0], [1], [0, 0, 1, 1], [], []>} : vector<8x128xbf16>, vector<128x512xbf16>, vector<8x512xf32> -> vector<8x512xf32>
    %117 = arith.addf %113, %116 : vector<8x512xf32>
    %118 = vector.extract_strided_slice %117 {offsets = [0, 0], sizes = [8, 128], strides = [1, 1]} : vector<8x512xf32> to vector<8x128xf32>
    %119 = arith.negf %118 : vector<8x128xf32>
    %120 = math.exp %119 : vector<8x128xf32>
    %cst_38 = arith.constant 1.000000e+00 : f32
    %121 = vector.broadcast %cst_38 : f32 to vector<8x128xf32>
    %122 = arith.addf %121, %120 : vector<8x128xf32>
    %123 = arith.divf %121, %122 : vector<8x128xf32>
    %124 = vector.extract_strided_slice %117 {offsets = [0, 128], sizes = [8, 128], strides = [1, 1]} : vector<8x512xf32> to vector<8x128xf32>
    %125 = arith.negf %124 : vector<8x128xf32>
    %126 = math.exp %125 : vector<8x128xf32>
    %cst_39 = arith.constant 1.000000e+00 : f32
    %127 = vector.broadcast %cst_39 : f32 to vector<8x128xf32>
    %128 = arith.addf %127, %126 : vector<8x128xf32>
    %129 = arith.divf %127, %128 : vector<8x128xf32>
    %130 = vector.extract_strided_slice %117 {offsets = [0, 256], sizes = [8, 128], strides = [1, 1]} : vector<8x512xf32> to vector<8x128xf32>
    %131 = math.tanh %130 : vector<8x128xf32>
    %132 = vector.extract_strided_slice %117 {offsets = [0, 384], sizes = [8, 128], strides = [1, 1]} : vector<8x512xf32> to vector<8x128xf32>
    %133 = arith.negf %132 : vector<8x128xf32>
    %134 = math.exp %133 : vector<8x128xf32>
    %cst_40 = arith.constant 1.000000e+00 : f32
    %135 = vector.broadcast %cst_40 : f32 to vector<8x128xf32>
    %136 = arith.addf %135, %134 : vector<8x128xf32>
    %137 = arith.divf %135, %136 : vector<8x128xf32>
    %138 = arith.mulf %129, %107 : vector<8x128xf32>
    %139 = arith.mulf %123, %131 : vector<8x128xf32>
    %140 = arith.addf %138, %139 : vector<8x128xf32>
    %141 = math.tanh %140 : vector<8x128xf32>
    %142 = arith.mulf %137, %141 : vector<8x128xf32>
    %c4_i32 = arith.constant 4 : i32
    %c8_i32_41 = arith.constant 8 : i32
    %143 = arith.muli %c4_i32, %c8_i32_41 : i32
    %144 = tpu.assume_multiple %143, 8 : i32
    %145 = arith.index_cast %144 : i32 to index
    %c0_42 = arith.constant 0 : index
    %146 = vector.load %arg10[%145, %c0_42] : memref<64x512xf32, #tpu.memory_space<vmem>>, vector<8x512xf32>
    %147 = arith.truncf %142 : vector<8x128xf32> to vector<8x128xbf16>
    %c0_43 = arith.constant 0 : index
    %c0_44 = arith.constant 0 : index
    %148 = vector.load %arg3[%c0_43, %c0_44] : memref<128x512xbf16, #tpu.memory_space<vmem>>, vector<128x512xbf16>
    %cst_45 = arith.constant dense<0.000000e+00> : vector<8x512xf32>
    %149 = tpu.matmul %147, %148, %cst_45 {dimension_numbers = #tpu.dot_dimension_numbers<[1], [0], [0], [1], [0, 0, 1, 1], [], []>} : vector<8x128xbf16>, vector<128x512xbf16>, vector<8x512xf32> -> vector<8x512xf32>
    %150 = arith.addf %146, %149 : vector<8x512xf32>
    %151 = vector.extract_strided_slice %150 {offsets = [0, 0], sizes = [8, 128], strides = [1, 1]} : vector<8x512xf32> to vector<8x128xf32>
    %152 = arith.negf %151 : vector<8x128xf32>
    %153 = math.exp %152 : vector<8x128xf32>
    %cst_46 = arith.constant 1.000000e+00 : f32
    %154 = vector.broadcast %cst_46 : f32 to vector<8x128xf32>
    %155 = arith.addf %154, %153 : vector<8x128xf32>
    %156 = arith.divf %154, %155 : vector<8x128xf32>
    %157 = vector.extract_strided_slice %150 {offsets = [0, 128], sizes = [8, 128], strides = [1, 1]} : vector<8x512xf32> to vector<8x128xf32>
    %158 = arith.negf %157 : vector<8x128xf32>
    %159 = math.exp %158 : vector<8x128xf32>
    %cst_47 = arith.constant 1.000000e+00 : f32
    %160 = vector.broadcast %cst_47 : f32 to vector<8x128xf32>
    %161 = arith.addf %160, %159 : vector<8x128xf32>
    %162 = arith.divf %160, %161 : vector<8x128xf32>
    %163 = vector.extract_strided_slice %150 {offsets = [0, 256], sizes = [8, 128], strides = [1, 1]} : vector<8x512xf32> to vector<8x128xf32>
    %164 = math.tanh %163 : vector<8x128xf32>
    %165 = vector.extract_strided_slice %150 {offsets = [0, 384], sizes = [8, 128], strides = [1, 1]} : vector<8x512xf32> to vector<8x128xf32>
    %166 = arith.negf %165 : vector<8x128xf32>
    %167 = math.exp %166 : vector<8x128xf32>
    %cst_48 = arith.constant 1.000000e+00 : f32
    %168 = vector.broadcast %cst_48 : f32 to vector<8x128xf32>
    %169 = arith.addf %168, %167 : vector<8x128xf32>
    %170 = arith.divf %168, %169 : vector<8x128xf32>
    %171 = arith.mulf %162, %140 : vector<8x128xf32>
    %172 = arith.mulf %156, %164 : vector<8x128xf32>
    %173 = arith.addf %171, %172 : vector<8x128xf32>
    %174 = math.tanh %173 : vector<8x128xf32>
    %175 = arith.mulf %170, %174 : vector<8x128xf32>
    %c5_i32 = arith.constant 5 : i32
    %c8_i32_49 = arith.constant 8 : i32
    %176 = arith.muli %c5_i32, %c8_i32_49 : i32
    %177 = tpu.assume_multiple %176, 8 : i32
    %178 = arith.index_cast %177 : i32 to index
    %c0_50 = arith.constant 0 : index
    %179 = vector.load %arg10[%178, %c0_50] : memref<64x512xf32, #tpu.memory_space<vmem>>, vector<8x512xf32>
    %180 = arith.truncf %175 : vector<8x128xf32> to vector<8x128xbf16>
    %c0_51 = arith.constant 0 : index
    %c0_52 = arith.constant 0 : index
    %181 = vector.load %arg3[%c0_51, %c0_52] : memref<128x512xbf16, #tpu.memory_space<vmem>>, vector<128x512xbf16>
    %cst_53 = arith.constant dense<0.000000e+00> : vector<8x512xf32>
    %182 = tpu.matmul %180, %181, %cst_53 {dimension_numbers = #tpu.dot_dimension_numbers<[1], [0], [0], [1], [0, 0, 1, 1], [], []>} : vector<8x128xbf16>, vector<128x512xbf16>, vector<8x512xf32> -> vector<8x512xf32>
    %183 = arith.addf %179, %182 : vector<8x512xf32>
    %184 = vector.extract_strided_slice %183 {offsets = [0, 0], sizes = [8, 128], strides = [1, 1]} : vector<8x512xf32> to vector<8x128xf32>
    %185 = arith.negf %184 : vector<8x128xf32>
    %186 = math.exp %185 : vector<8x128xf32>
    %cst_54 = arith.constant 1.000000e+00 : f32
    %187 = vector.broadcast %cst_54 : f32 to vector<8x128xf32>
    %188 = arith.addf %187, %186 : vector<8x128xf32>
    %189 = arith.divf %187, %188 : vector<8x128xf32>
    %190 = vector.extract_strided_slice %183 {offsets = [0, 128], sizes = [8, 128], strides = [1, 1]} : vector<8x512xf32> to vector<8x128xf32>
    %191 = arith.negf %190 : vector<8x128xf32>
    %192 = math.exp %191 : vector<8x128xf32>
    %cst_55 = arith.constant 1.000000e+00 : f32
    %193 = vector.broadcast %cst_55 : f32 to vector<8x128xf32>
    %194 = arith.addf %193, %192 : vector<8x128xf32>
    %195 = arith.divf %193, %194 : vector<8x128xf32>
    %196 = vector.extract_strided_slice %183 {offsets = [0, 256], sizes = [8, 128], strides = [1, 1]} : vector<8x512xf32> to vector<8x128xf32>
    %197 = math.tanh %196 : vector<8x128xf32>
    %198 = vector.extract_strided_slice %183 {offsets = [0, 384], sizes = [8, 128], strides = [1, 1]} : vector<8x512xf32> to vector<8x128xf32>
    %199 = arith.negf %198 : vector<8x128xf32>
    %200 = math.exp %199 : vector<8x128xf32>
    %cst_56 = arith.constant 1.000000e+00 : f32
    %201 = vector.broadcast %cst_56 : f32 to vector<8x128xf32>
    %202 = arith.addf %201, %200 : vector<8x128xf32>
    %203 = arith.divf %201, %202 : vector<8x128xf32>
    %204 = arith.mulf %195, %173 : vector<8x128xf32>
    %205 = arith.mulf %189, %197 : vector<8x128xf32>
    %206 = arith.addf %204, %205 : vector<8x128xf32>
    %207 = math.tanh %206 : vector<8x128xf32>
    %208 = arith.mulf %203, %207 : vector<8x128xf32>
    %c6_i32 = arith.constant 6 : i32
    %c8_i32_57 = arith.constant 8 : i32
    %209 = arith.muli %c6_i32, %c8_i32_57 : i32
    %210 = tpu.assume_multiple %209, 8 : i32
    %211 = arith.index_cast %210 : i32 to index
    %c0_58 = arith.constant 0 : index
    %212 = vector.load %arg10[%211, %c0_58] : memref<64x512xf32, #tpu.memory_space<vmem>>, vector<8x512xf32>
    %213 = arith.truncf %208 : vector<8x128xf32> to vector<8x128xbf16>
    %c0_59 = arith.constant 0 : index
    %c0_60 = arith.constant 0 : index
    %214 = vector.load %arg3[%c0_59, %c0_60] : memref<128x512xbf16, #tpu.memory_space<vmem>>, vector<128x512xbf16>
    %cst_61 = arith.constant dense<0.000000e+00> : vector<8x512xf32>
    %215 = tpu.matmul %213, %214, %cst_61 {dimension_numbers = #tpu.dot_dimension_numbers<[1], [0], [0], [1], [0, 0, 1, 1], [], []>} : vector<8x128xbf16>, vector<128x512xbf16>, vector<8x512xf32> -> vector<8x512xf32>
    %216 = arith.addf %212, %215 : vector<8x512xf32>
    %217 = vector.extract_strided_slice %216 {offsets = [0, 0], sizes = [8, 128], strides = [1, 1]} : vector<8x512xf32> to vector<8x128xf32>
    %218 = arith.negf %217 : vector<8x128xf32>
    %219 = math.exp %218 : vector<8x128xf32>
    %cst_62 = arith.constant 1.000000e+00 : f32
    %220 = vector.broadcast %cst_62 : f32 to vector<8x128xf32>
    %221 = arith.addf %220, %219 : vector<8x128xf32>
    %222 = arith.divf %220, %221 : vector<8x128xf32>
    %223 = vector.extract_strided_slice %216 {offsets = [0, 128], sizes = [8, 128], strides = [1, 1]} : vector<8x512xf32> to vector<8x128xf32>
    %224 = arith.negf %223 : vector<8x128xf32>
    %225 = math.exp %224 : vector<8x128xf32>
    %cst_63 = arith.constant 1.000000e+00 : f32
    %226 = vector.broadcast %cst_63 : f32 to vector<8x128xf32>
    %227 = arith.addf %226, %225 : vector<8x128xf32>
    %228 = arith.divf %226, %227 : vector<8x128xf32>
    %229 = vector.extract_strided_slice %216 {offsets = [0, 256], sizes = [8, 128], strides = [1, 1]} : vector<8x512xf32> to vector<8x128xf32>
    %230 = math.tanh %229 : vector<8x128xf32>
    %231 = vector.extract_strided_slice %216 {offsets = [0, 384], sizes = [8, 128], strides = [1, 1]} : vector<8x512xf32> to vector<8x128xf32>
    %232 = arith.negf %231 : vector<8x128xf32>
    %233 = math.exp %232 : vector<8x128xf32>
    %cst_64 = arith.constant 1.000000e+00 : f32
    %234 = vector.broadcast %cst_64 : f32 to vector<8x128xf32>
    %235 = arith.addf %234, %233 : vector<8x128xf32>
    %236 = arith.divf %234, %235 : vector<8x128xf32>
    %237 = arith.mulf %228, %206 : vector<8x128xf32>
    %238 = arith.mulf %222, %230 : vector<8x128xf32>
    %239 = arith.addf %237, %238 : vector<8x128xf32>
    %240 = math.tanh %239 : vector<8x128xf32>
    %241 = arith.mulf %236, %240 : vector<8x128xf32>
    %c7_i32 = arith.constant 7 : i32
    %c8_i32_65 = arith.constant 8 : i32
    %242 = arith.muli %c7_i32, %c8_i32_65 : i32
    %243 = tpu.assume_multiple %242, 8 : i32
    %244 = arith.index_cast %243 : i32 to index
    %c0_66 = arith.constant 0 : index
    %245 = vector.load %arg10[%244, %c0_66] : memref<64x512xf32, #tpu.memory_space<vmem>>, vector<8x512xf32>
    %246 = arith.truncf %241 : vector<8x128xf32> to vector<8x128xbf16>
    %c0_67 = arith.constant 0 : index
    %c0_68 = arith.constant 0 : index
    %247 = vector.load %arg3[%c0_67, %c0_68] : memref<128x512xbf16, #tpu.memory_space<vmem>>, vector<128x512xbf16>
    %cst_69 = arith.constant dense<0.000000e+00> : vector<8x512xf32>
    %248 = tpu.matmul %246, %247, %cst_69 {dimension_numbers = #tpu.dot_dimension_numbers<[1], [0], [0], [1], [0, 0, 1, 1], [], []>} : vector<8x128xbf16>, vector<128x512xbf16>, vector<8x512xf32> -> vector<8x512xf32>
    %249 = arith.addf %245, %248 : vector<8x512xf32>
    %250 = vector.extract_strided_slice %249 {offsets = [0, 0], sizes = [8, 128], strides = [1, 1]} : vector<8x512xf32> to vector<8x128xf32>
    %251 = arith.negf %250 : vector<8x128xf32>
    %252 = math.exp %251 : vector<8x128xf32>
    %cst_70 = arith.constant 1.000000e+00 : f32
    %253 = vector.broadcast %cst_70 : f32 to vector<8x128xf32>
    %254 = arith.addf %253, %252 : vector<8x128xf32>
    %255 = arith.divf %253, %254 : vector<8x128xf32>
    %256 = vector.extract_strided_slice %249 {offsets = [0, 128], sizes = [8, 128], strides = [1, 1]} : vector<8x512xf32> to vector<8x128xf32>
    %257 = arith.negf %256 : vector<8x128xf32>
    %258 = math.exp %257 : vector<8x128xf32>
    %cst_71 = arith.constant 1.000000e+00 : f32
    %259 = vector.broadcast %cst_71 : f32 to vector<8x128xf32>
    %260 = arith.addf %259, %258 : vector<8x128xf32>
    %261 = arith.divf %259, %260 : vector<8x128xf32>
    %262 = vector.extract_strided_slice %249 {offsets = [0, 256], sizes = [8, 128], strides = [1, 1]} : vector<8x512xf32> to vector<8x128xf32>
    %263 = math.tanh %262 : vector<8x128xf32>
    %264 = vector.extract_strided_slice %249 {offsets = [0, 384], sizes = [8, 128], strides = [1, 1]} : vector<8x512xf32> to vector<8x128xf32>
    %265 = arith.negf %264 : vector<8x128xf32>
    %266 = math.exp %265 : vector<8x128xf32>
    %cst_72 = arith.constant 1.000000e+00 : f32
    %267 = vector.broadcast %cst_72 : f32 to vector<8x128xf32>
    %268 = arith.addf %267, %266 : vector<8x128xf32>
    %269 = arith.divf %267, %268 : vector<8x128xf32>
    %270 = arith.mulf %261, %239 : vector<8x128xf32>
    %271 = arith.mulf %255, %263 : vector<8x128xf32>
    %272 = arith.addf %270, %271 : vector<8x128xf32>
    %273 = math.tanh %272 : vector<8x128xf32>
    %274 = arith.mulf %269, %273 : vector<8x128xf32>
    %c8_i32_73 = arith.constant 8 : i32
    %cst_74 = arith.constant 0.000000e+00 : f32
    %275 = vector.broadcast %cst_74 : f32 to vector<8x128xf32>
    %276 = arith.maximumf %274, %275 : vector<8x128xf32>
    %277 = arith.truncf %276 : vector<8x128xf32> to vector<8x128xbf16>
    %c0_75 = arith.constant 0 : index
    %c0_76 = arith.constant 0 : index
    %278 = vector.load %arg5[%c0_75, %c0_76] : memref<128x128xbf16, #tpu.memory_space<vmem>>, vector<128x128xbf16>
    %cst_77 = arith.constant dense<0.000000e+00> : vector<8x128xf32>
    %279 = tpu.matmul %277, %278, %cst_77 {dimension_numbers = #tpu.dot_dimension_numbers<[1], [0], [0], [1], [0, 0, 1, 1], [], []>} : vector<8x128xbf16>, vector<128x128xbf16>, vector<8x128xf32> -> vector<8x128xf32>
    %c0_78 = arith.constant 0 : index
    %c0_79 = arith.constant 0 : index
    %280 = vector.load %arg6[%c0_78, %c0_79] : memref<1x128xf32, #tpu.memory_space<vmem>>, vector<1x128xf32>
    %281 = vector.broadcast %280 : vector<1x128xf32> to vector<8x128xf32>
    %282 = arith.addf %279, %281 : vector<8x128xf32>
    %cst_80 = arith.constant 0.000000e+00 : f32
    %283 = vector.broadcast %cst_80 : f32 to vector<8x128xf32>
    %284 = arith.maximumf %282, %283 : vector<8x128xf32>
    %285 = arith.truncf %284 : vector<8x128xf32> to vector<8x128xbf16>
    %c0_81 = arith.constant 0 : index
    %c0_82 = arith.constant 0 : index
    %286 = vector.load %arg7[%c0_81, %c0_82] : memref<128x128xbf16, #tpu.memory_space<vmem>>, vector<128x128xbf16>
    %cst_83 = arith.constant dense<0.000000e+00> : vector<8x128xf32>
    %287 = tpu.matmul %285, %286, %cst_83 {dimension_numbers = #tpu.dot_dimension_numbers<[1], [0], [0], [1], [0, 0, 1, 1], [], []>} : vector<8x128xbf16>, vector<128x128xbf16>, vector<8x128xf32> -> vector<8x128xf32>
    %c0_84 = arith.constant 0 : index
    %c0_85 = arith.constant 0 : index
    %288 = vector.load %arg8[%c0_84, %c0_85] : memref<1x128xf32, #tpu.memory_space<vmem>>, vector<1x128xf32>
    %289 = vector.broadcast %288 : vector<1x128xf32> to vector<8x128xf32>
    %290 = arith.addf %287, %289 : vector<8x128xf32>
    %c0_86 = arith.constant 0 : index
    %c0_87 = arith.constant 0 : index
    %291 = vector.load %arg9[%c0_86, %c0_87] : memref<8x128xf32, #tpu.memory_space<vmem>>, vector<8x128xf32>
    tpu.vector_store %arg9[%c0_86, %c0_87], %290 {strides = array<i32>} : memref<8x128xf32, #tpu.memory_space<vmem>>, vector<8x128xf32>,
    return
  }
  func.func @transform_0(%arg0: i32) -> (i32, i32, i32) {
    %c0_i32 = arith.constant 0 : i32
    %c0_i32_0 = arith.constant 0 : i32
    %c0_i32_1 = arith.constant 0 : i32
    return %c0_i32, %arg0, %c0_i32_0 : i32, i32, i32
  }
  func.func @transform_1(%arg0: i32) -> (i32, i32) {
    %c0_i32 = arith.constant 0 : i32
    %c0_i32_0 = arith.constant 0 : i32
    %c0_i32_1 = arith.constant 0 : i32
    return %c0_i32, %c0_i32_0 : i32, i32
  }
  func.func @transform_2(%arg0: i32) -> (i32, i32) {
    %c0_i32 = arith.constant 0 : i32
    %c0_i32_0 = arith.constant 0 : i32
    %c0_i32_1 = arith.constant 0 : i32
    return %c0_i32, %c0_i32_0 : i32, i32
  }
  func.func @transform_3(%arg0: i32) -> (i32, i32) {
    %c0_i32 = arith.constant 0 : i32
    %c0_i32_0 = arith.constant 0 : i32
    %c0_i32_1 = arith.constant 0 : i32
    return %c0_i32, %c0_i32_0 : i32, i32
  }
  func.func @transform_4(%arg0: i32) -> (i32, i32) {
    %c0_i32 = arith.constant 0 : i32
    %c0_i32_0 = arith.constant 0 : i32
    %c0_i32_1 = arith.constant 0 : i32
    return %c0_i32, %c0_i32_0 : i32, i32
  }
  func.func @transform_5(%arg0: i32) -> (i32, i32) {
    %c0_i32 = arith.constant 0 : i32
    %c0_i32_0 = arith.constant 0 : i32
    %c0_i32_1 = arith.constant 0 : i32
    return %c0_i32, %c0_i32_0 : i32, i32
  }
  func.func @transform_6(%arg0: i32) -> (i32, i32) {
    %c0_i32 = arith.constant 0 : i32
    %c0_i32_0 = arith.constant 0 : i32
    %c0_i32_1 = arith.constant 0 : i32
    return %c0_i32, %c0_i32_0 : i32, i32
  }
  func.func @transform_7(%arg0: i32) -> (i32, i32) {
    %c0_i32 = arith.constant 0 : i32
    %c0_i32_0 = arith.constant 0 : i32
    %c0_i32_1 = arith.constant 0 : i32
    return %c0_i32, %c0_i32_0 : i32, i32
  }
  func.func @transform_8(%arg0: i32) -> (i32, i32) {
    %c0_i32 = arith.constant 0 : i32
    %c0_i32_0 = arith.constant 0 : i32
    return %arg0, %c0_i32 : i32, i32
  }
}

</mosaic_0001>

<bundles_post_ra>
// kernel: tpu_custom_call.1
= control target key start
LH: loop header
LB: loop body
LE: loop exit
PB: predicated region body
PF: predicated region fallthrough
CT: control target
= control target key end

     0   :  { %13 = vsyncpa [#allocation4], 0  ;;  %s2990_s0 = inlined_call_operand.hbm [shape: f32[8,8,8], index: 0, kind: input, shape index: {}]   ;;  %s2991_s1 = inlined_call_operand.hbm [shape: bf16[8,512], index: 1, kind: input, shape index: {}]   ;;  %s2992_s2 = inlined_call_operand.hbm [shape: bf16[128,512], index: 2, kind: input, shape index: {}]   ;;  %s2993_s3 = inlined_call_operand.vmem [shape: f32[1,512], index: 3, kind: input, shape index: {}]   ;;  %s2994_s4 = inlined_call_operand.hbm [shape: bf16[128,128], index: 4, kind: input, shape index: {}]   ;;  %s2995_s5 = inlined_call_operand.vmem [shape: f32[1,128], index: 5, kind: input, shape index: {}]   ;;  %s2996_s6 = inlined_call_operand.hbm [shape: bf16[128,128], index: 6, kind: input, shape index: {}]   ;;  %s2997_s7 = inlined_call_operand.vmem [shape: f32[1,128], index: 7, kind: input, shape index: {}]   ;;  %s2998_s8 = inlined_call_operand.hbm [shape: f32[8,128], index: 8, kind: output, shape index: {}]  }
   0x1   :  { %14 = vsyncpa [#allocation7], 0 }
   0x2   :  { %15 = vsyncpa [#allocation10], 0 }
   0x3   :  { %16 = vsyncpa [#allocation5], 0  ;;  %s2262_s27 = smov [#allocation6]   ;;  %s2263_s29 = smov [#allocation9]  }
   0x4   :  { %s35_s28 = sshll.u32 %s2262_s27, 4  ;;  %s58_s30 = sshll.u32 %s2263_s29, 4  ;;  %s36_s28 = int_to_ptr.vmem [resolvable:$true] %s35_s28  ;;  %s2322_s30 = int_to_ptr.vmem [resolvable:$true] %s58_s30 }
   0x5   :  { %s2122_s11 = scalar_lea.hbm %s2991_s1, 256 }
   0x6   :  { %p2123_p0 = scmp.ne.s32.totalorder %s2991_s1, %s2122_s11  ;;  %p2126_p1 = scmp.lt.u32.totalorder %s2122_s11, %s2991_s1 }
   0x8   :  { %p2128_p2 = pnand %p2126_p1, %p2123_p0 }
   0xa   :  { %2131 = shalt.err (!%p2128_p2)
}
   0xb   :  { %s2132_s16 = scalar_lea.vmem %s36_s28, 256  ;;  %p2137_p4 = scmp.lt.s32.totalorder %s36_s28, %s36_s28 }
   0xc   :  { %p2133_p3 = scmp.ne.s32.totalorder %s36_s28, %s2132_s16  ;;  %p2138_p5 = scmp.lt.s32.totalorder %s2132_s16, %s2132_s16 }
   0xe   :  { %p2139_p6 = por %p2138_p5, %p2137_p4 }
  0x10   :  { %p2140_p7 = pnand %p2139_p6, %p2133_p3 }
  0x12   :  { %2143 = shalt.err (!%p2140_p7)
}
  0x13   :  { %38 = dma.hbm_to_vmem [thread:$0]  %s2991_s1, 256, %s36_s28, [#allocation7]  }
  0x14   :  { %s2144_s21 = scalar_lea.hbm %s2994_s4, 1024 }
  0x15   :  { %p2145_p8 = scmp.ne.s32.totalorder %s2994_s4, %s2144_s21  ;;  %p2148_p9 = scmp.lt.u32.totalorder %s2144_s21, %s2994_s4 }
  0x17   :  { %p2150_p10 = pnand %p2148_p9, %p2145_p8 }
  0x19   :  { %2153 = shalt.err (!%p2150_p10)
}
  0x1a   :  { %s2154_s26 = scalar_lea.vmem %s2322_s30, 1024  ;;  %p2159_p12 = scmp.lt.s32.totalorder %s2322_s30, %s2322_s30 }
  0x1b   :  { %p2155_p11 = scmp.ne.s32.totalorder %s2322_s30, %s2154_s26  ;;  %p2160_p13 = scmp.lt.s32.totalorder %s2154_s26, %s2154_s26 }
  0x1d   :  { %p2161_p0 = por %p2160_p13, %p2159_p12 }
  0x1f   :  { %p2162_p1 = pnand %p2161_p0, %p2155_p11 }
  0x21   :  { %2165 = shalt.err (!%p2162_p1)
}
  0x22   :  { %s2264_s1 = smov 64   ;;  %s2265_s27 = smov 4  }
  0x23   :  { %64 = dma.hbm_to_vmem [thread:$0]  %s2994_s4, 1024, %s2322_s30, [#allocation10], %s2264_s1, %s2264_s1, %s2265_s27  }
  0x24   :  { %s2266_s9 = smov [#allocation3]   ;;  %s2166_s13 = scalar_lea.hbm %s2990_s0, 1024 }
  0x25   :  { %s22_s10 = sshll.u32 %s2266_s9, 4  ;;  %p2167_p2 = scmp.ne.s32.totalorder %s2990_s0, %s2166_s13  ;;  %s23_s10 = int_to_ptr.vmem [resolvable:$true] %s22_s10 }
  0x26   :  { %p2170_p3 = scmp.lt.u32.totalorder %s2166_s13, %s2990_s0 }
  0x28   :  { %p2172_p4 = pnand %p2170_p3, %p2167_p2 }
  0x2a   :  { %2175 = shalt.err (!%p2172_p4)
}
  0x2b   :  { %s2176_s18 = scalar_lea.vmem %s23_s10, 1024  ;;  %p2181_p6 = scmp.lt.s32.totalorder %s23_s10, %s23_s10 }
  0x2c   :  { %p2177_p5 = scmp.ne.s32.totalorder %s23_s10, %s2176_s18  ;;  %p2182_p7 = scmp.lt.s32.totalorder %s2176_s18, %s2176_s18 }
  0x2e   :  { %p2183_p8 = por %p2182_p7, %p2181_p6 }
  0x30   :  { %p2184_p9 = pnand %p2183_p8, %p2177_p5 }
  0x32   :  { %2187 = shalt.err (!%p2184_p9)
}
  0x33   :  { %s2267_s4 = smov 128   ;;  %s2268_s30 = smov 8  }
  0x34   :  { %28 = dma.hbm_to_vmem [thread:$0]  %s2990_s0, 1024, %s23_s10, [#allocation4], %s2267_s4, %s2267_s4, %s2268_s30  }
  0x35   :  { %s2269_s21 = smov [#allocation8]   ;;  %s2188_s25 = scalar_lea.hbm %s2992_s2, 4096 }
  0x36   :  { %s44_s22 = sshll.u32 %s2269_s21, 4  ;;  %p2189_p10 = scmp.ne.s32.totalorder %s2992_s2, %s2188_s25  ;;  %s45_s22 = int_to_ptr.vmem [resolvable:$true] %s44_s22 }
  0x37   :  { %p2192_p11 = scmp.lt.u32.totalorder %s2188_s25, %s2992_s2 }
  0x39   :  { %p2194_p12 = pnand %p2192_p11, %p2189_p10 }
  0x3b   :  { %2197 = shalt.err (!%p2194_p12)
}
  0x3c   :  { %s2198_s11 = scalar_lea.vmem %s45_s22, 4096  ;;  %p2203_p0 = scmp.lt.s32.totalorder %s45_s22, %s45_s22 }
  0x3d   :  { %p2199_p13 = scmp.ne.s32.totalorder %s45_s22, %s2198_s11  ;;  %p2204_p1 = scmp.lt.s32.totalorder %s2198_s11, %s2198_s11 }
  0x3f   :  { %p2205_p2 = por %p2204_p1, %p2203_p0 }
  0x41   :  { %p2206_p3 = pnand %p2205_p2, %p2199_p13 }
  0x43   :  { %2209 = shalt.err (!%p2206_p3)
}
  0x44   :  { %s2270_s0 = smov 256   ;;  %s2271_s10 = smov 16  }
  0x45   :  { %50 = dma.hbm_to_vmem [thread:$0]  %s2992_s2, 4096, %s45_s22, [#allocation7], %s2270_s0, %s2270_s0, %s2271_s10  }
  0x46   :  { %s2272_s14 = smov [#allocation11]   ;;  %s2210_s18 = scalar_lea.hbm %s2996_s6, 1024 }
  0x47   :  { %s72_s15 = sshll.u32 %s2272_s14, 4  ;;  %p2211_p4 = scmp.ne.s32.totalorder %s2996_s6, %s2210_s18  ;;  %s73_s15 = int_to_ptr.vmem [resolvable:$true] %s72_s15 }
  0x48   :  { %p2214_p5 = scmp.lt.u32.totalorder %s2210_s18, %s2996_s6 }
  0x4a   :  { %p2216_p6 = pnand %p2214_p5, %p2211_p4 }
  0x4c   :  { %2219 = shalt.err (!%p2216_p6)
}
  0x4d   :  { %s2220_s21 = scalar_lea.vmem %s73_s15, 1024  ;;  %p2225_p8 = scmp.lt.s32.totalorder %s73_s15, %s73_s15 }
  0x4e   :  { %p2221_p7 = scmp.ne.s32.totalorder %s73_s15, %s2220_s21  ;;  %p2226_p9 = scmp.lt.s32.totalorder %s2220_s21, %s2220_s21 }
  0x50   :  { %p2227_p10 = por %p2226_p9, %p2225_p8 }
  0x52   :  { %p2228_p11 = pnand %p2227_p10, %p2221_p7 }
  0x54   :  { %2231 = shalt.err (!%p2228_p11)
}
  0x55   :  { %78 = dma.hbm_to_vmem [thread:$0]  %s2996_s6, 1024, %s73_s15, [#allocation10], %s2264_s1, %s2264_s1, %s2265_s27  }
  0x56   :  { %2254 = dma.done.wait [#allocation4], 1024  }
  0x57   :  { %2255 = vsyncadd [#allocation4], 4294966272 }
  0x58   :  { %2256 = dma.done.wait [#allocation7], 4352  }
  0x59   :  { %2257 = vsyncadd [#allocation7], 4294962944 }
  0x5a   :  { %2258 = dma.done.wait [#allocation10], 2048  }
  0x5b   :  { %2259 = vsyncadd [#allocation10], 4294965248  ;;  %v2999_v0 = vmov 0   ;;  %v109_v1 = vld [vmem:[#allocation6] sm:$0xff]  ;;  %vm156_vm0 = vcmask 1043456   ;;  %v110_v2 = vld [vmem:[#allocation6 + $0x8] sm:$0xff]  ;;  %v113_v53 = vlaneseq }
  0x5c   :  { %201 = vmatprep.mubr.bf16.mxu0 %v2999_v0  ;;  %274 = vmatprep.mubr.bf16.mxu1 %v2999_v0  ;;  %v97_v3 = vld [vmem:[#allocation3] sm:$0xff]  ;;  %v1734_v4 = vcombine.high %v109_v1, %v109_v1  ;;  %v1736_v5 = vcombine.high %v110_v2, %v110_v2  ;;  %v1733_v6 = vcombine.low %v109_v1, %v109_v1  ;;  %v98_v8 = vld [vmem:[#allocation3 + $0x8] sm:$0xff]  ;;  %vm143_vm1 = vcmask 64512   ;;  %v99_v20 = vld [vmem:[#allocation3 + $0x10] sm:$0xff]  ;;  %s2276_s25 = smov [#allocation12]  }
  0x5d   :  { %v1735_v7 = vcombine.low %v110_v2, %v110_v2  ;;  %v2397_v9 = vld [vmem:[#allocation8 + $0x4] ss:$16 sps:$4 sm:$0xff]   ;;  %v105_v12 = vpack.c.bf16 %v98_v8, %v97_v3  ;;  %v2399_v13 = vld [vmem:[#allocation8 + $0xc] ss:$16 sps:$4 sm:$0xff]   ;;  %v2401_v14 = vld [vmem:[#allocation8] ss:$16 sps:$4 sm:$0xff]  }
  0x5e   :  { %1737 = vmatprep.subr.msk.bf16.mxu0 %vm156_vm0, %v1734_v4  ;;  %1742 = vmatprep.subr.msk.bf16.mxu1 %vm156_vm0, %v1736_v5  ;;  %v158_v10 = vsel %vm156_vm0, %v1733_v6, 0  ;;  %v2403_v15 = vld [vmem:[#allocation8 + $0x8] ss:$16 sps:$4 sm:$0xff]   ;;  %v2407_v16 = vld [vmem:[#allocation8 + $0x24] ss:$16 sps:$4 sm:$0xff]   ;;  %v114_v54 = vshrl.u32 %v113_v53, 7 }
  0x5f   :  { %v164_v11 = vsel %vm156_vm0, %v1735_v7, 0  ;;  %170 = vmatpush1.bf16.msra.mxu0 %v158_v10  ;;  %v2409_v17 = vld [vmem:[#allocation8 + $0x2c] ss:$16 sps:$4 sm:$0xff]   ;;  %v2411_v18 = vld [vmem:[#allocation8 + $0x20] ss:$16 sps:$4 sm:$0xff]   ;;  %vm2275_vm2 = vmmov 0  }
  0x60   :  { %243 = vmatpush1.bf16.msra.mxu1 %v164_v11  ;;  %546 = vmatprep.subr.bf16.mxu0 %v2397_v9  ;;  %v2415_v19 = vld [vmem:[#allocation8 + $0x28] ss:$16 sps:$4 sm:$0xff]   ;;  %v2421_v22 = vld [vmem:[#allocation8 + $0x44] ss:$16 sps:$4 sm:$0xff]   ;;  %v2423_v23 = vld [vmem:[#allocation8 + $0x4c] ss:$16 sps:$4 sm:$0xff]  }
  0x61   :  { %587 = vmatprep.subr.bf16.mxu1 %v2399_v13  ;;  %v100_v21 = vld [vmem:[#allocation3 + $0x18] sm:$0xff]  ;;  %v2429_v25 = vld [vmem:[#allocation8 + $0x40] ss:$16 sps:$4 sm:$0xff]   ;;  %v2435_v27 = vld [vmem:[#allocation8 + $0x64] ss:$16 sps:$4 sm:$0xff]   ;;  %v123_v55 = vsub.s32 2, %v114_v54 }
  0x62   :  { %1738 = vmatmul.mubr.msk.bf16.vlgmr.msra.gmra.mrb[0].mxu0 %vm143_vm1, %v105_v12  ;;  %v106_v24 = vpack.c.bf16 %v100_v21, %v99_v20  ;;  %v2431_v26 = vld [vmem:[#allocation8 + $0x48] ss:$16 sps:$4 sm:$0xff]   ;;  %v2437_v28 = vld [vmem:[#allocation8 + $0x6c] ss:$16 sps:$4 sm:$0xff]   ;;  %v2439_v29 = vld [vmem:[#allocation8 + $0x60] ss:$16 sps:$4 sm:$0xff]  }
  0x63   :  { %1743 = vmatmul.mubr.msk.bf16.vlgmr.msra.gmra.mrb[0].mxu1 %vm143_vm1, %v105_v12  ;;  %547 = vmatpush1.bf16.msra.mxu0 %v2401_v14  ;;  %v2441_v30 = vld [vmem:[#allocation8 + $0x68] ss:$16 sps:$4 sm:$0xff]   ;;  %v101_v31 = vld [vmem:[#allocation3 + $0x20] sm:$0xff]  ;;  %v2451_v34 = vld [vmem:[#allocation8 + $0x8c] ss:$16 sps:$4 sm:$0xff]   ;;  %v127_v56 = vsub.s32 3, %v114_v54 }
  0x64   :  { %588 = vmatpush1.bf16.msra.mxu1 %v2403_v15  ;;  %548 = vmatprep.subr.bf16.mxu0 %v2407_v16  ;;  %v102_v32 = vld [vmem:[#allocation3 + $0x28] sm:$0xff]  ;;  %v2447_v33 = vld [vmem:[#allocation8 + $0x84] ss:$16 sps:$4 sm:$0xff]   ;;  %v2455_v36 = vld [vmem:[#allocation8 + $0x80] ss:$16 sps:$4 sm:$0xff]   ;;  %v115_v57 = vsub.s32 0, %v114_v54 }
  0x65   :  { %589 = vmatprep.subr.bf16.mxu1 %v2409_v17  ;;  %211 = vmatprep.mubr.bf16.mxu0 %v2999_v0  ;;  %v107_v35 = vpack.c.bf16 %v102_v32, %v101_v31  ;;  %v2459_v37 = vld [vmem:[#allocation8 + $0x88] ss:$16 sps:$4 sm:$0xff]   ;;  %v2463_v38 = vld [vmem:[#allocation8 + $0xa4] ss:$16 sps:$4 sm:$0xff]   ;;  %v2465_v39 = vld [vmem:[#allocation8 + $0xac] ss:$16 sps:$4 sm:$0xff]  }
  0x66   :  { %284 = vmatprep.mubr.bf16.mxu1 %v2999_v0  ;;  %v2467_v40 = vld [vmem:[#allocation8 + $0xa0] ss:$16 sps:$4 sm:$0xff]   ;;  %v2471_v41 = vld [vmem:[#allocation8 + $0xa8] ss:$16 sps:$4 sm:$0xff]   ;;  %v2475_v44 = vld [vmem:[#allocation8 + $0xc4] ss:$16 sps:$4 sm:$0xff]  }
  0x67   :  { %549 = vmatpush1.bf16.msra.mxu0 %v2411_v18  ;;  %v103_v42 = vld [vmem:[#allocation3 + $0x30] sm:$0xff]  ;;  %v104_v43 = vld [vmem:[#allocation3 + $0x38] sm:$0xff]  ;;  %v111_v58 = vld [vmem:[%s2993_s3] sm:$0xf]  ;;  %v119_v59 = vsub.s32 1, %v114_v54  ;;  %s1715_s26 = sshll.u32 %s2276_s25, 4  ;;  %s1716_s26 = int_to_ptr.vmem [resolvable:$true] %s1715_s26 }
  0x68   :  { %590 = vmatpush1.bf16.msra.mxu1 %v2415_v19  ;;  %550 = vmatprep.subr.bf16.mxu0 %v2421_v22  ;;  %v2479_v45 = vld [vmem:[#allocation8 + $0xcc] ss:$16 sps:$4 sm:$0xff]   ;;  %v2483_v46 = vld [vmem:[#allocation8 + $0xc0] ss:$16 sps:$4 sm:$0xff]   ;;  %v2485_v47 = vld [vmem:[#allocation8 + $0xc8] ss:$16 sps:$4 sm:$0xff]   ;;  %v108_v48 = vpack.c.bf16 %v104_v43, %v103_v42  ;;  %v2550_v60 = vrot.slane %v111_v58, %v123_v55  ;;  %v2556_v63 = vrot.slane %v111_v58, %v127_v56  ;;  %p2237_p13 = scmp.lt.s32.totalorder %s1716_s26, %s1716_s26 }
  0x69   :  { %591 = vmatprep.subr.bf16.mxu1 %v2423_v23  ;;  %v2487_v49 = vld [vmem:[#allocation8 + $0xe4] ss:$16 sps:$4 sm:$0xff]   ;;  %v2489_v50 = vld [vmem:[#allocation8 + $0xec] ss:$16 sps:$4 sm:$0xff]   ;;  %v2495_v51 = vld [vmem:[#allocation8 + $0xe0] ss:$16 sps:$4 sm:$0xff]   ;;  %v116_v1 = vrot.slane %v111_v58, %v115_v57  ;;  %v120_v4 = vrot.slane %v111_v58, %v119_v59 }
  0x6a   :  { %1739 = vmatmul.mubr.msk.bf16.gmra.mrb[4].mxu0 %vm143_vm1, %v106_v24  ;;  %v2497_v52 = vld [vmem:[#allocation8 + $0xe8] ss:$16 sps:$4 sm:$0xff]  }
  0x6b   :  { %1744 = vmatmul.mubr.msk.bf16.gmra.mrb[4].mxu1 %vm143_vm1, %v106_v24  ;;  %551 = vmatpush1.bf16.msra.mxu0 %v2429_v25 }
  0x6c   :  { %592 = vmatpush1.bf16.msra.mxu1 %v2431_v26  ;;  %552 = vmatprep.subr.bf16.mxu0 %v2435_v27 }
  0x6d   :  { %593 = vmatprep.subr.bf16.mxu1 %v2437_v28  ;;  %221 = vmatprep.mubr.bf16.mxu0 %v2999_v0 }
  0x6e   :  { %294 = vmatprep.mubr.bf16.mxu1 %v2999_v0 }
  0x6f   :  { %553 = vmatpush1.bf16.msra.mxu0 %v2439_v29 }
  0x70   :  { %594 = vmatpush1.bf16.msra.mxu1 %v2441_v30  ;;  %554 = vmatprep.subr.bf16.mxu0 %v2447_v33 }
  0x71   :  { %595 = vmatprep.subr.bf16.mxu1 %v2451_v34 }
  0x72   :  { %1740 = vmatmul.mubr.msk.bf16.gmra.mrb[8].mxu0 %vm143_vm1, %v107_v35 }
  0x73   :  { %1745 = vmatmul.mubr.msk.bf16.gmra.mrb[8].mxu1 %vm143_vm1, %v107_v35  ;;  %555 = vmatpush1.bf16.msra.mxu0 %v2455_v36 }
  0x74   :  { %596 = vmatpush1.bf16.msra.mxu1 %v2459_v37  ;;  %556 = vmatprep.subr.bf16.mxu0 %v2463_v38 }
  0x75   :  { %597 = vmatprep.subr.bf16.mxu1 %v2465_v39  ;;  %231 = vmatprep.mubr.bf16.mxu0 %v2999_v0 }
  0x76   :  { %304 = vmatprep.mubr.bf16.mxu1 %v2999_v0 }
  0x77   :  { %557 = vmatpush1.bf16.msra.mxu0 %v2467_v40 }
  0x78   :  { %598 = vmatpush1.bf16.msra.mxu1 %v2471_v41  ;;  %558 = vmatprep.subr.bf16.mxu0 %v2475_v44 }
  0x79   :  { %599 = vmatprep.subr.bf16.mxu1 %v2479_v45 }
  0x7a   :  { %1741 = vmatmul.mubr.msk.bf16.gmra.mrb[12].mxu0 %vm143_vm1, %v108_v48 }
  0x7b   :  { %1746 = vmatmul.mubr.msk.bf16.gmra.mrb[12].mxu1 %vm143_vm1, %v108_v48  ;;  %559 = vmatpush1.bf16.msra.mxu0 %v2483_v46 }
  0x7c   :  { %600 = vmatpush1.bf16.msra.mxu1 %v2485_v47  ;;  %560 = vmatprep.subr.bf16.mxu0 %v2487_v49 }
  0x7d   :  { %601 = vmatprep.subr.bf16.mxu1 %v2489_v50  ;;  %578 = vmatprep.mubr.bf16.mxu0 %v2999_v0 }
  0x7e   :  { %619 = vmatprep.mubr.bf16.mxu1 %v2999_v0 }
  0x7f   :  { %561 = vmatpush1.bf16.msra.mxu0 %v2495_v51 }
  0x80   :  { %602 = vmatpush1.bf16.msra.mxu1 %v2497_v52  ;;  %664 = vmatprep.subr.bf16.mxu0 %v2397_v9 }
  0x81   :  { %705 = vmatprep.subr.bf16.mxu1 %v2399_v13 }
  0x82   :  { %579 = vmatmul.mubr.bf16.vlgmr.msra.gmra.mrb[16].mxu0 %v2999_v0 }
  0x83   :  { %620 = vmatmul.mubr.bf16.vlgmr.msra.gmra.mrb[16].mxu1 %v2999_v0  ;;  %665 = vmatpush1.bf16.msra.mxu0 %v2401_v14 }
  0x84   :  { %706 = vmatpush1.bf16.msra.mxu1 %v2403_v15  ;;  %666 = vmatprep.subr.bf16.mxu0 %v2407_v16 }
  0x85   :  { %707 = vmatprep.subr.bf16.mxu1 %v2409_v17  ;;  %696 = vmatprep.mubr.bf16.mxu0 %v2999_v0 }
  0x86   :  { %737 = vmatprep.mubr.bf16.mxu1 %v2999_v0 }
  0x87   :  { %667 = vmatpush1.bf16.msra.mxu0 %v2411_v18 }
  0x88   :  { %708 = vmatpush1.bf16.msra.mxu1 %v2415_v19  ;;  %668 = vmatprep.subr.bf16.mxu0 %v2421_v22 }
  0x89   :  { %709 = vmatprep.subr.bf16.mxu1 %v2423_v23 }
  0x8b   :  { %669 = vmatpush1.bf16.msra.mxu0 %v2429_v25 }
  0x8c   :  { %710 = vmatpush1.bf16.msra.mxu1 %v2431_v26  ;;  %670 = vmatprep.subr.bf16.mxu0 %v2435_v27 }
  0x8d   :  { %711 = vmatprep.subr.bf16.mxu1 %v2437_v28 }
  0x8f   :  { %671 = vmatpush1.bf16.msra.mxu0 %v2439_v29 }
  0x90   :  { %712 = vmatpush1.bf16.msra.mxu1 %v2441_v30  ;;  %672 = vmatprep.subr.bf16.mxu0 %v2447_v33 }
  0x91   :  { %713 = vmatprep.subr.bf16.mxu1 %v2451_v34 }
  0x93   :  { %673 = vmatpush1.bf16.msra.mxu0 %v2455_v36 }
  0x94   :  { %714 = vmatpush1.bf16.msra.mxu1 %v2459_v37  ;;  %674 = vmatprep.subr.bf16.mxu0 %v2463_v38 }
  0x95   :  { %715 = vmatprep.subr.bf16.mxu1 %v2465_v39 }
  0x97   :  { %675 = vmatpush1.bf16.msra.mxu0 %v2467_v40 }
  0x98   :  { %716 = vmatpush1.bf16.msra.mxu1 %v2471_v41  ;;  %676 = vmatprep.subr.bf16.mxu0 %v2475_v44 }
  0x99   :  { %717 = vmatprep.subr.bf16.mxu1 %v2479_v45 }
  0x9b   :  { %677 = vmatpush1.bf16.msra.mxu0 %v2483_v46 }
  0x9c   :  { %718 = vmatpush1.bf16.msra.mxu1 %v2485_v47  ;;  %678 = vmatprep.subr.bf16.mxu0 %v2487_v49 }
  0x9d   :  { %719 = vmatprep.subr.bf16.mxu1 %v2489_v50 }
  0x9f   :  { %679 = vmatpush1.bf16.msra.mxu0 %v2495_v51 }
  0xa0   :  { %720 = vmatpush1.bf16.msra.mxu1 %v2497_v52  ;;  %782 = vmatprep.subr.bf16.mxu0 %v2397_v9 }
  0xa1   :  { %823 = vmatprep.subr.bf16.mxu1 %v2399_v13 }
 0x135   :  { %v2552_v61 = vpop.f32.mrb[0].mxu0 }
 0x136   :  { %v2554_v62 = vpop.f32.mrb[0].mxu1  ;;  %v205_v2 = vpop.f32.mrb[1].mxu0 }
 0x137   :  { %v278_v3 = vpop.f32.mrb[1].mxu1  ;;  %v207_v5 = vpop.f32.mrb[2].mxu0 }
 0x138   :  { %v280_v6 = vpop.f32.mrb[2].mxu1  ;;  %v2558_v7 = vadd.f32 %v207_v5, %v116_v1  ;;  %v209_v8 = vpop.f32.mrb[3].mxu0 }
 0x139   :  { %v2561_v10 = vadd.f32 %v280_v6, %v2550_v60  ;;  %v282_v11 = vpop.f32.mrb[3].mxu1  ;;  %v2563_v12 = vadd.f32 %v209_v8, %v120_v4 }
 0x13a   :  { %v2566_v20 = vadd.f32 %v282_v11, %v2556_v63 }
 0x13d   :  { %v213_v21 = vpop.f32.mrb[4].mxu0 }
 0x13e   :  { %v286_v24 = vpop.f32.mrb[4].mxu1  ;;  %v2568_v31 = vadd.f32 %v213_v21, %v116_v1  ;;  %v215_v32 = vpop.f32.mrb[5].mxu0 }
 0x13f   :  { %v2571_v35 = vadd.f32 %v286_v24, %v2550_v60  ;;  %v288_v42 = vpop.f32.mrb[5].mxu1  ;;  %v2573_v43 = vadd.f32 %v215_v32, %v120_v4  ;;  %v217_v48 = vpop.f32.mrb[6].mxu0 }
 0x140   :  { %v2576_v53 = vadd.f32 %v288_v42, %v2556_v63  ;;  %v290_v54 = vpop.f32.mrb[6].mxu1  ;;  %v2578_v55 = vadd.f32 %v217_v48, %v116_v1  ;;  %v219_v56 = vpop.f32.mrb[7].mxu0 }
 0x141   :  { %v2581_v57 = vadd.f32 %v290_v54, %v2550_v60  ;;  %v292_v58 = vpop.f32.mrb[7].mxu1  ;;  %v2583_v59 = vadd.f32 %v219_v56, %v120_v4 }
 0x142   :  { %3001 = vst [vmem:[#allocation17_spill] sm:$0xff] %v2576_v53  ;;  %3002 = vst [vmem:[#allocation18_spill] sm:$0xff] %v2578_v55  ;;  %v2586_v5 = vadd.f32 %v292_v58, %v2556_v63 }
 0x143   :  { %3003 = vst [vmem:[#allocation19_spill] sm:$0xff] %v2581_v57  ;;  %3004 = vst [vmem:[#allocation20_spill] sm:$0xff] %v2583_v59 }
 0x144   :  { %3005 = vst [vmem:[#allocation21_spill] sm:$0xff] %v2586_v5 }
 0x145   :  { %v223_v6 = vpop.f32.mrb[8].mxu0 }
 0x146   :  { %v296_v8 = vpop.f32.mrb[8].mxu1  ;;  %v2588_v11 = vadd.f32 %v223_v6, %v116_v1  ;;  %v225_v21 = vpop.f32.mrb[9].mxu0 }
 0x147   :  { %v2591_v24 = vadd.f32 %v296_v8, %v2550_v60  ;;  %v298_v32 = vpop.f32.mrb[9].mxu1  ;;  %v2593_v42 = vadd.f32 %v225_v21, %v120_v4  ;;  %v227_v48 = vpop.f32.mrb[10].mxu0 }
 0x148   :  { %3006 = vst [vmem:[#allocation22_spill] sm:$0xff] %v2588_v11  ;;  %v2596_v54 = vadd.f32 %v298_v32, %v2556_v63  ;;  %v300_v56 = vpop.f32.mrb[10].mxu1  ;;  %v2598_v0 = vadd.f32 %v227_v48, %v116_v1  ;;  %v229_v58 = vpop.f32.mrb[11].mxu0 }
 0x149   :  { %3007 = vst [vmem:[#allocation23_spill] sm:$0xff] %v2591_v24  ;;  %3008 = vst [vmem:[#allocation24_spill] sm:$0xff] %v2593_v42  ;;  %v2601_v5 = vadd.f32 %v300_v56, %v2550_v60  ;;  %v302_v6 = vpop.f32.mrb[11].mxu1  ;;  %v2603_v11 = vadd.f32 %v229_v58, %v120_v4 }
 0x14a   :  { %3009 = vst [vmem:[#allocation25_spill] sm:$0xff] %v2596_v54  ;;  %3010 = vst [vmem:[#allocation26_spill] sm:$0xff] %v2598_v0  ;;  %v2606_v8 = vadd.f32 %v302_v6, %v2556_v63 }
 0x14b   :  { %3011 = vst [vmem:[#allocation27_spill] sm:$0xff] %v2601_v5  ;;  %3012 = vst [vmem:[#allocation28_spill] sm:$0xff] %v2603_v11 }
 0x14c   :  { %3013 = vst [vmem:[#allocation29_spill] sm:$0xff] %v2606_v8 }
 0x14d   :  { %v233_v24 = vpop.f32.mrb[12].mxu0 }
 0x14e   :  { %v306_v21 = vpop.f32.mrb[12].mxu1  ;;  %v2608_v42 = vadd.f32 %v233_v24, %v116_v1  ;;  %v235_v59 = vpop.f32.mrb[13].mxu0 }
 0x14f   :  { %v2611_v32 = vadd.f32 %v306_v21, %v2550_v60  ;;  %v308_v48 = vpop.f32.mrb[13].mxu1  ;;  %v2613_v0 = vadd.f32 %v235_v59, %v120_v4  ;;  %v237_v54 = vpop.f32.mrb[14].mxu0  ;;  %v204_v59 = vadd.f32 %v2552_v61, %v116_v1 }
 0x150   :  { %3014 = vst [vmem:[#allocation30_spill] sm:$0xff] %v2608_v42  ;;  %v2616_v56 = vadd.f32 %v308_v48, %v2556_v63  ;;  %v310_v58 = vpop.f32.mrb[14].mxu1  ;;  %v2618_v11 = vadd.f32 %v237_v54, %v116_v1  ;;  %v239_v6 = vpop.f32.mrb[15].mxu0  ;;  %v206_v48 = vadd.f32 %v205_v2, %v120_v4 }
 0x151   :  { %3015 = vst [vmem:[#allocation31_spill] sm:$0xff] %v2611_v32  ;;  %3016 = vst [vmem:[#allocation32_spill] sm:$0xff] %v2613_v0  ;;  %v2621_v8 = vadd.f32 %v310_v58, %v2550_v60  ;;  %v312_v24 = vpop.f32.mrb[15].mxu1  ;;  %v2623_v42 = vadd.f32 %v239_v6, %v120_v4  ;;  %v277_v0 = vadd.f32 %v2554_v62, %v2550_v60 }
 0x152   :  { %3017 = vst [vmem:[#allocation33_spill] sm:$0xff] %v2616_v56  ;;  %3018 = vst [vmem:[#allocation34_spill] sm:$0xff] %v2618_v11  ;;  %v2626_v21 = vadd.f32 %v312_v24, %v2556_v63  ;;  %v279_v56 = vadd.f32 %v278_v3, %v2556_v63 }
 0x153   :  { %3019 = vst [vmem:[#allocation35_spill] sm:$0xff] %v2621_v8  ;;  %3020 = vst [vmem:[#allocation36_spill] sm:$0xff] %v2623_v42 }
 0x154   :  { %3021 = vst [vmem:[#allocation37_spill] sm:$0xff] %v2626_v21 }
 0x155   :  { %v580_v54 = vpop.f32.mrb[16].mxu0 }
 0x156   :  { %v621_v11 = vpop.f32.mrb[16].mxu1  ;;  %v628_v32 = vadd.f32 %v580_v54, %v204_v59  ;;  %v582_v58 = vpop.f32.mrb[17].mxu0 }
 0x157   :  { %v630_v5 = vadd.f32 %v621_v11, %v277_v0  ;;  %v623_v8 = vpop.f32.mrb[17].mxu1  ;;  %v629_v57 = vadd.f32 %v582_v58, %v206_v48  ;;  %v584_v42 = vpop.f32.mrb[18].mxu0 }
 0x158   :  { %v631_v6 = vadd.f32 %v623_v8, %v279_v56  ;;  %v625_v55 = vpop.f32.mrb[18].mxu1  ;;  %v1779_v24 = vmul.f32 -1.442695, %v628_v32  ;;  %v585_v21 = vpop.f32.mrb[19].mxu0 }
 0x159   :  { %v626_v53 = vpop.f32.mrb[19].mxu1  ;;  %v1780_v61 = vmul.f32 -1.442695, %v629_v57 }
 0x15a   :  { %1962 = vpow2.f32 %v1779_v24  ;;  %v1781_v60 = vmul.f32 -1.442695, %v631_v6 }
 0x15b   :  { %1964 = vpow2.f32 %v1780_v61 }
 0x15c   :  { %1966 = vpow2.f32 %v1781_v60 }
 0x15d   :  { %1968 = vtanh.f32 %v630_v5  ;;  %v3022_v5 = vmov 0  }
 0x164   :  { %v1963_v62 = vpop.eup %1962 }
 0x165   :  { %v1965_v1 = vpop.eup %1964  ;;  %v635_v63 = vadd.f32 1.0, %v1963_v62 }
 0x166   :  { %v641_v2 = vadd.f32 1.0, %v1965_v1  ;;  %v1967_v0 = vpop.eup %1966 }
 0x167   :  { %1970 = vrcp.f32 %v635_v63  ;;  %v1969_v3 = vpop.eup %1968  ;;  %v648_v42 = vadd.f32 1.0, %v1967_v0 }
 0x168   :  { %1972 = vrcp.f32 %v641_v2 }
 0x169   :  { %1974 = vrcp.f32 %v648_v42 }
 0x171   :  { %v1971_v4 = vpop.eup %1970 }
 0x172   :  { %v1973_v11 = vpop.eup %1972  ;;  %v652_v55 = vmul.f32 %v1971_v4, %v1969_v3 }
 0x173   :  { %v651_v8 = vmul.f32 0.0, %v1973_v11  ;;  %v1975_v57 = vpop.eup %1974 }
 0x175   :  { %v2632_v53 = vadd.f32 %v652_v55, %v651_v8 }
 0x177   :  { %1976 = vtanh.f32 %v2632_v53 }
 0x181   :  { %v1977_v32 = vpop.eup %1976 }
 0x182   :  { %v655_v56 = vmul.f32 %v1977_v32, %v1975_v57 }
 0x184   :  { %v663_v21 = vpack.c.bf16 %v655_v56, %v655_v56 }
 0x186   :  { %697 = vmatmul.mubr.bf16.vlgmr.msra.gmra.mrb[20].mxu0 %v663_v21  ;;  %738 = vmatmul.mubr.bf16.vlgmr.msra.gmra.mrb[20].mxu1 %v663_v21 }
 0x187   :  { %783 = vmatpush1.bf16.msra.mxu0 %v2401_v14  ;;  %824 = vmatpush1.bf16.msra.mxu1 %v2403_v15 }
 0x188   :  { %784 = vmatprep.subr.bf16.mxu0 %v2407_v16  ;;  %825 = vmatprep.subr.bf16.mxu1 %v2409_v17 }
 0x189   :  { %814 = vmatprep.mubr.bf16.mxu0 %v3022_v5  ;;  %855 = vmatprep.mubr.bf16.mxu1 %v3022_v5 }
 0x18b   :  { %785 = vmatpush1.bf16.msra.mxu0 %v2411_v18  ;;  %826 = vmatpush1.bf16.msra.mxu1 %v2415_v19 }
 0x18c   :  { %786 = vmatprep.subr.bf16.mxu0 %v2421_v22  ;;  %827 = vmatprep.subr.bf16.mxu1 %v2423_v23 }
 0x18f   :  { %787 = vmatpush1.bf16.msra.mxu0 %v2429_v25  ;;  %828 = vmatpush1.bf16.msra.mxu1 %v2431_v26 }
 0x190   :  { %788 = vmatprep.subr.bf16.mxu0 %v2435_v27  ;;  %829 = vmatprep.subr.bf16.mxu1 %v2437_v28 }
 0x193   :  { %789 = vmatpush1.bf16.msra.mxu0 %v2439_v29  ;;  %830 = vmatpush1.bf16.msra.mxu1 %v2441_v30 }
 0x194   :  { %790 = vmatprep.subr.bf16.mxu0 %v2447_v33  ;;  %831 = vmatprep.subr.bf16.mxu1 %v2451_v34 }
 0x197   :  { %791 = vmatpush1.bf16.msra.mxu0 %v2455_v36  ;;  %832 = vmatpush1.bf16.msra.mxu1 %v2459_v37 }
 0x198   :  { %792 = vmatprep.subr.bf16.mxu0 %v2463_v38  ;;  %833 = vmatprep.subr.bf16.mxu1 %v2465_v39 }
 0x19b   :  { %793 = vmatpush1.bf16.msra.mxu0 %v2467_v40  ;;  %834 = vmatpush1.bf16.msra.mxu1 %v2471_v41 }
 0x19c   :  { %794 = vmatprep.subr.bf16.mxu0 %v2475_v44  ;;  %835 = vmatprep.subr.bf16.mxu1 %v2479_v45 }
 0x19f   :  { %795 = vmatpush1.bf16.msra.mxu0 %v2483_v46  ;;  %836 = vmatpush1.bf16.msra.mxu1 %v2485_v47 }
 0x1a0   :  { %796 = vmatprep.subr.bf16.mxu0 %v2487_v49  ;;  %837 = vmatprep.subr.bf16.mxu1 %v2489_v50 }
 0x1a3   :  { %797 = vmatpush1.bf16.msra.mxu0 %v2495_v51  ;;  %838 = vmatpush1.bf16.msra.mxu1 %v2497_v52 }
 0x1a4   :  { %900 = vmatprep.subr.bf16.mxu0 %v2397_v9  ;;  %941 = vmatprep.subr.bf16.mxu1 %v2399_v13 }
 0x259   :  { %v698_v59 = vpop.f32.mrb[20].mxu0  ;;  %v739_v48 = vpop.f32.mrb[20].mxu1 }
 0x25a   :  { %v746_v54 = vadd.f32 %v698_v59, %v2558_v7  ;;  %v748_v58 = vadd.f32 %v739_v48, %v2561_v10  ;;  %v700_v6 = vpop.f32.mrb[21].mxu0  ;;  %v741_v24 = vpop.f32.mrb[21].mxu1 }
 0x25b   :  { %v747_v61 = vadd.f32 %v700_v6, %v2563_v12  ;;  %v749_v60 = vadd.f32 %v741_v24, %v2566_v20  ;;  %v702_v62 = vpop.f32.mrb[22].mxu0  ;;  %v743_v1 = vpop.f32.mrb[22].mxu1 }
 0x25c   :  { %v1782_v63 = vmul.f32 -1.442695, %v746_v54  ;;  %v703_v2 = vpop.f32.mrb[23].mxu0  ;;  %v744_v0 = vpop.f32.mrb[23].mxu1 }
 0x25d   :  { %v1783_v3 = vmul.f32 -1.442695, %v747_v61  ;;  %v1784_v4 = vmul.f32 -1.442695, %v749_v60 }
 0x25e   :  { %1978 = vpow2.f32 %v1782_v63  ;;  %v3023_v63 = vld [vmem:[#allocation17_spill] sm:$0xff] }
 0x25f   :  { %1980 = vpow2.f32 %v1783_v3 }
 0x260   :  { %1982 = vpow2.f32 %v1784_v4 }
 0x261   :  { %1984 = vtanh.f32 %v748_v58 }
 0x268   :  { %v1979_v11 = vpop.eup %1978 }
 0x269   :  { %v1981_v55 = vpop.eup %1980  ;;  %v753_v7 = vadd.f32 1.0, %v1979_v11 }
 0x26a   :  { %v759_v10 = vadd.f32 1.0, %v1981_v55  ;;  %v1983_v12 = vpop.eup %1982 }
 0x26b   :  { %1986 = vrcp.f32 %v753_v7  ;;  %v1985_v42 = vpop.eup %1984  ;;  %v766_v32 = vadd.f32 1.0, %v1983_v12 }
 0x26c   :  { %1988 = vrcp.f32 %v759_v10 }
 0x26d   :  { %1990 = vrcp.f32 %v766_v32 }
 0x275   :  { %v1987_v20 = vpop.eup %1986 }
 0x276   :  { %v1989_v8 = vpop.eup %1988  ;;  %v770_v57 = vmul.f32 %v1987_v20, %v1985_v42 }
 0x277   :  { %v769_v56 = vmul.f32 %v1989_v8, %v2632_v53  ;;  %v1991_v59 = vpop.eup %1990 }
 0x279   :  { %v2674_v21 = vadd.f32 %v770_v57, %v769_v56 }
 0x27b   :  { %1992 = vtanh.f32 %v2674_v21 }
 0x285   :  { %v1993_v48 = vpop.eup %1992 }
 0x286   :  { %v773_v54 = vmul.f32 %v1993_v48, %v1991_v59 }
 0x288   :  { %v781_v58 = vpack.c.bf16 %v773_v54, %v773_v54 }
 0x28a   :  { %815 = vmatmul.mubr.bf16.vlgmr.msra.gmra.mrb[24].mxu0 %v781_v58  ;;  %856 = vmatmul.mubr.bf16.vlgmr.msra.gmra.mrb[24].mxu1 %v781_v58 }
 0x28b   :  { %901 = vmatpush1.bf16.msra.mxu0 %v2401_v14  ;;  %942 = vmatpush1.bf16.msra.mxu1 %v2403_v15 }
 0x28c   :  { %902 = vmatprep.subr.bf16.mxu0 %v2407_v16  ;;  %943 = vmatprep.subr.bf16.mxu1 %v2409_v17 }
 0x28d   :  { %932 = vmatprep.mubr.bf16.mxu0 %v3022_v5  ;;  %973 = vmatprep.mubr.bf16.mxu1 %v3022_v5 }
 0x28f   :  { %903 = vmatpush1.bf16.msra.mxu0 %v2411_v18  ;;  %944 = vmatpush1.bf16.msra.mxu1 %v2415_v19 }
 0x290   :  { %904 = vmatprep.subr.bf16.mxu0 %v2421_v22  ;;  %945 = vmatprep.subr.bf16.mxu1 %v2423_v23 }
 0x293   :  { %905 = vmatpush1.bf16.msra.mxu0 %v2429_v25  ;;  %946 = vmatpush1.bf16.msra.mxu1 %v2431_v26 }
 0x294   :  { %906 = vmatprep.subr.bf16.mxu0 %v2435_v27  ;;  %947 = vmatprep.subr.bf16.mxu1 %v2437_v28 }
 0x297   :  { %907 = vmatpush1.bf16.msra.mxu0 %v2439_v29  ;;  %948 = vmatpush1.bf16.msra.mxu1 %v2441_v30 }
 0x298   :  { %908 = vmatprep.subr.bf16.mxu0 %v2447_v33  ;;  %949 = vmatprep.subr.bf16.mxu1 %v2451_v34 }
 0x29b   :  { %909 = vmatpush1.bf16.msra.mxu0 %v2455_v36  ;;  %950 = vmatpush1.bf16.msra.mxu1 %v2459_v37 }
 0x29c   :  { %910 = vmatprep.subr.bf16.mxu0 %v2463_v38  ;;  %951 = vmatprep.subr.bf16.mxu1 %v2465_v39 }
 0x29f   :  { %911 = vmatpush1.bf16.msra.mxu0 %v2467_v40  ;;  %952 = vmatpush1.bf16.msra.mxu1 %v2471_v41 }
 0x2a0   :  { %912 = vmatprep.subr.bf16.mxu0 %v2475_v44  ;;  %953 = vmatprep.subr.bf16.mxu1 %v2479_v45 }
 0x2a3   :  { %913 = vmatpush1.bf16.msra.mxu0 %v2483_v46  ;;  %954 = vmatpush1.bf16.msra.mxu1 %v2485_v47 }
 0x2a4   :  { %914 = vmatprep.subr.bf16.mxu0 %v2487_v49  ;;  %955 = vmatprep.subr.bf16.mxu1 %v2489_v50 }
 0x2a7   :  { %915 = vmatpush1.bf16.msra.mxu0 %v2495_v51  ;;  %956 = vmatpush1.bf16.msra.mxu1 %v2497_v52 }
 0x2a8   :  { %1018 = vmatprep.subr.bf16.mxu0 %v2397_v9  ;;  %1059 = vmatprep.subr.bf16.mxu1 %v2399_v13 }
 0x35d   :  { %v816_v53 = vpop.f32.mrb[24].mxu0  ;;  %v857_v6 = vpop.f32.mrb[24].mxu1 }
 0x35e   :  { %v864_v24 = vadd.f32 %v816_v53, %v2568_v31  ;;  %v866_v61 = vadd.f32 %v857_v6, %v2571_v35  ;;  %v818_v60 = vpop.f32.mrb[25].mxu0  ;;  %v859_v62 = vpop.f32.mrb[25].mxu1 }
 0x35f   :  { %v865_v1 = vadd.f32 %v818_v60, %v2573_v43  ;;  %v867_v2 = vadd.f32 %v859_v62, %v3023_v63  ;;  %v820_v0 = vpop.f32.mrb[26].mxu0  ;;  %v861_v3 = vpop.f32.mrb[26].mxu1  ;;  %v3027_v62 = vld [vmem:[#allocation21_spill] sm:$0xff] }
 0x360   :  { %v1785_v4 = vmul.f32 -1.442695, %v864_v24  ;;  %v821_v11 = vpop.f32.mrb[27].mxu0  ;;  %v862_v55 = vpop.f32.mrb[27].mxu1 }
 0x361   :  { %v1786_v7 = vmul.f32 -1.442695, %v865_v1  ;;  %v1787_v10 = vmul.f32 -1.442695, %v867_v2 }
 0x362   :  { %1994 = vpow2.f32 %v1785_v4 }
 0x363   :  { %1996 = vpow2.f32 %v1786_v7 }
 0x364   :  { %1998 = vpow2.f32 %v1787_v10 }
 0x365   :  { %2000 = vtanh.f32 %v866_v61  ;;  %v3026_v61 = vld [vmem:[#allocation20_spill] sm:$0xff] }
 0x36c   :  { %v1995_v12 = vpop.eup %1994 }
 0x36d   :  { %v1997_v42 = vpop.eup %1996  ;;  %v871_v31 = vadd.f32 1.0, %v1995_v12 }
 0x36e   :  { %v877_v35 = vadd.f32 1.0, %v1997_v42  ;;  %v1999_v43 = vpop.eup %1998 }
 0x36f   :  { %2002 = vrcp.f32 %v871_v31  ;;  %v2001_v20 = vpop.eup %2000  ;;  %v884_v56 = vadd.f32 1.0, %v1999_v43 }
 0x370   :  { %2004 = vrcp.f32 %v877_v35 }
 0x371   :  { %2006 = vrcp.f32 %v884_v56 }
 0x379   :  { %v2003_v8 = vpop.eup %2002 }
 0x37a   :  { %v2005_v57 = vpop.eup %2004  ;;  %v888_v32 = vmul.f32 %v2003_v8, %v2001_v20 }
 0x37b   :  { %v887_v59 = vmul.f32 %v2005_v57, %v2674_v21  ;;  %v2007_v54 = vpop.eup %2006 }
 0x37d   :  { %v2716_v48 = vadd.f32 %v888_v32, %v887_v59 }
 0x37f   :  { %2008 = vtanh.f32 %v2716_v48 }
 0x389   :  { %v2009_v58 = vpop.eup %2008 }
 0x38a   :  { %v891_v53 = vmul.f32 %v2009_v58, %v2007_v54  ;;  %v2761_v58 = vld [vmem:[#allocation8] ss:$16 sps:$4 sm:$0xff]  }
 0x38c   :  { %v899_v6 = vpack.c.bf16 %v891_v53, %v891_v53  ;;  %v2764_v53 = vld [vmem:[#allocation8 + $0x8] ss:$16 sps:$4 sm:$0xff]  }
 0x38e   :  { %933 = vmatmul.mubr.bf16.vlgmr.msra.gmra.mrb[28].mxu0 %v899_v6  ;;  %974 = vmatmul.mubr.bf16.vlgmr.msra.gmra.mrb[28].mxu1 %v899_v6  ;;  %v2770_v6 = vld [vmem:[#allocation8 + $0x2c] ss:$16 sps:$4 sm:$0xff]  }
 0x38f   :  { %1019 = vmatpush1.bf16.msra.mxu0 %v2401_v14  ;;  %1060 = vmatpush1.bf16.msra.mxu1 %v2403_v15 }
 0x390   :  { %1020 = vmatprep.subr.bf16.mxu0 %v2407_v16  ;;  %1061 = vmatprep.subr.bf16.mxu1 %v2409_v17  ;;  %v3024_v16 = vld [vmem:[#allocation18_spill] sm:$0xff] }
 0x391   :  { %1050 = vmatprep.mubr.bf16.mxu0 %v3022_v5  ;;  %1091 = vmatprep.mubr.bf16.mxu1 %v3022_v5 }
 0x393   :  { %1021 = vmatpush1.bf16.msra.mxu0 %v2411_v18  ;;  %1062 = vmatpush1.bf16.msra.mxu1 %v2415_v19  ;;  %v3025_v18 = vld [vmem:[#allocation19_spill] sm:$0xff] }
 0x394   :  { %1022 = vmatprep.subr.bf16.mxu0 %v2421_v22  ;;  %1063 = vmatprep.subr.bf16.mxu1 %v2423_v23 }
 0x397   :  { %1023 = vmatpush1.bf16.msra.mxu0 %v2429_v25  ;;  %1064 = vmatpush1.bf16.msra.mxu1 %v2431_v26 }
 0x398   :  { %1024 = vmatprep.subr.bf16.mxu0 %v2435_v27  ;;  %1065 = vmatprep.subr.bf16.mxu1 %v2437_v28 }
 0x39b   :  { %1025 = vmatpush1.bf16.msra.mxu0 %v2439_v29  ;;  %1066 = vmatpush1.bf16.msra.mxu1 %v2441_v30 }
 0x39c   :  { %1026 = vmatprep.subr.bf16.mxu0 %v2447_v33  ;;  %1067 = vmatprep.subr.bf16.mxu1 %v2451_v34 }
 0x39f   :  { %1027 = vmatpush1.bf16.msra.mxu0 %v2455_v36  ;;  %1068 = vmatpush1.bf16.msra.mxu1 %v2459_v37 }
 0x3a0   :  { %1028 = vmatprep.subr.bf16.mxu0 %v2463_v38  ;;  %1069 = vmatprep.subr.bf16.mxu1 %v2465_v39 }
 0x3a3   :  { %1029 = vmatpush1.bf16.msra.mxu0 %v2467_v40  ;;  %1070 = vmatpush1.bf16.msra.mxu1 %v2471_v41 }
 0x3a4   :  { %1030 = vmatprep.subr.bf16.mxu0 %v2475_v44  ;;  %1071 = vmatprep.subr.bf16.mxu1 %v2479_v45 }
 0x3a7   :  { %1031 = vmatpush1.bf16.msra.mxu0 %v2483_v46  ;;  %1072 = vmatpush1.bf16.msra.mxu1 %v2485_v47 }
 0x3a8   :  { %1032 = vmatprep.subr.bf16.mxu0 %v2487_v49  ;;  %1073 = vmatprep.subr.bf16.mxu1 %v2489_v50 }
 0x3ab   :  { %1033 = vmatpush1.bf16.msra.mxu0 %v2495_v51  ;;  %1074 = vmatpush1.bf16.msra.mxu1 %v2497_v52 }
 0x3ac   :  { %1136 = vmatprep.subr.bf16.mxu0 %v2397_v9  ;;  %1177 = vmatprep.subr.bf16.mxu1 %v2399_v13 }
 0x461   :  { %v934_v14 = vpop.f32.mrb[28].mxu0  ;;  %v975_v15 = vpop.f32.mrb[28].mxu1 }
 0x462   :  { %v982_v17 = vadd.f32 %v934_v14, %v3024_v16  ;;  %v984_v19 = vadd.f32 %v975_v15, %v3025_v18  ;;  %v936_v21 = vpop.f32.mrb[29].mxu0  ;;  %v977_v24 = vpop.f32.mrb[29].mxu1  ;;  %v2775_v14 = vld [vmem:[#allocation8 + $0x20] ss:$16 sps:$4 sm:$0xff]   ;;  %v2778_v15 = vld [vmem:[#allocation8 + $0x28] ss:$16 sps:$4 sm:$0xff]  }
 0x463   :  { %v983_v60 = vadd.f32 %v936_v21, %v3026_v61  ;;  %v985_v1 = vadd.f32 %v977_v24, %v3027_v62  ;;  %v938_v63 = vpop.f32.mrb[30].mxu0  ;;  %v979_v2 = vpop.f32.mrb[30].mxu1 }
 0x464   :  { %v1788_v0 = vmul.f32 -1.442695, %v982_v17  ;;  %v939_v3 = vpop.f32.mrb[31].mxu0  ;;  %v980_v4 = vpop.f32.mrb[31].mxu1 }
 0x465   :  { %v1789_v9 = vmul.f32 -1.442695, %v983_v60  ;;  %v1790_v13 = vmul.f32 -1.442695, %v985_v1  ;;  %v2827_v3 = vld [vmem:[#allocation8 + $0x44] ss:$16 sps:$4 sm:$0xff]  }
 0x466   :  { %2010 = vpow2.f32 %v1788_v0  ;;  %v2830_v4 = vld [vmem:[#allocation8 + $0x4c] ss:$16 sps:$4 sm:$0xff]  }
 0x467   :  { %2012 = vpow2.f32 %v1789_v9  ;;  %v2833_v9 = vld [vmem:[#allocation8 + $0x40] ss:$16 sps:$4 sm:$0xff]  }
 0x468   :  { %2014 = vpow2.f32 %v1790_v13  ;;  %v2836_v13 = vld [vmem:[#allocation8 + $0x48] ss:$16 sps:$4 sm:$0xff]  }
 0x469   :  { %2016 = vtanh.f32 %v984_v19 }
 0x470   :  { %v2011_v11 = vpop.eup %2010 }
 0x471   :  { %v2013_v55 = vpop.eup %2012  ;;  %v989_v7 = vadd.f32 1.0, %v2011_v11  ;;  %v2839_v11 = vld [vmem:[#allocation8 + $0x64] ss:$16 sps:$4 sm:$0xff]  }
 0x472   :  { %v995_v10 = vadd.f32 1.0, %v2013_v55  ;;  %v2015_v12 = vpop.eup %2014  ;;  %v2842_v55 = vld [vmem:[#allocation8 + $0x6c] ss:$16 sps:$4 sm:$0xff]  }
 0x473   :  { %2018 = vrcp.f32 %v989_v7  ;;  %v2017_v42 = vpop.eup %2016  ;;  %v1002_v20 = vadd.f32 1.0, %v2015_v12  ;;  %v2845_v7 = vld [vmem:[#allocation8 + $0x60] ss:$16 sps:$4 sm:$0xff]   ;;  %v2851_v12 = vld [vmem:[#allocation8 + $0x84] ss:$16 sps:$4 sm:$0xff]  }
 0x474   :  { %2020 = vrcp.f32 %v995_v10  ;;  %v2848_v10 = vld [vmem:[#allocation8 + $0x68] ss:$16 sps:$4 sm:$0xff]  }
 0x475   :  { %2022 = vrcp.f32 %v1002_v20  ;;  %v2866_v20 = vld [vmem:[#allocation8 + $0xac] ss:$16 sps:$4 sm:$0xff]  }
 0x47d   :  { %v2019_v31 = vpop.eup %2018 }
 0x47e   :  { %v2021_v35 = vpop.eup %2020  ;;  %v1006_v43 = vmul.f32 %v2019_v31, %v2017_v42  ;;  %v2854_v42 = vld [vmem:[#allocation8 + $0x8c] ss:$16 sps:$4 sm:$0xff]   ;;  %v2857_v31 = vld [vmem:[#allocation8 + $0x80] ss:$16 sps:$4 sm:$0xff]  }
 0x47f   :  { %v1005_v8 = vmul.f32 %v2021_v35, %v2716_v48  ;;  %v2023_v32 = vpop.eup %2022  ;;  %v2767_v48 = vld [vmem:[#allocation8 + $0x24] ss:$16 sps:$4 sm:$0xff]   ;;  %v2860_v35 = vld [vmem:[#allocation8 + $0x88] ss:$16 sps:$4 sm:$0xff]  }
 0x481   :  { %v2758_v57 = vadd.f32 %v1006_v43, %v1005_v8  ;;  %v2863_v43 = vld [vmem:[#allocation8 + $0xa4] ss:$16 sps:$4 sm:$0xff]   ;;  %v2869_v8 = vld [vmem:[#allocation8 + $0xa0] ss:$16 sps:$4 sm:$0xff]  }
 0x483   :  { %2024 = vtanh.f32 %v2758_v57 }
 0x48d   :  { %v2025_v56 = vpop.eup %2024 }
 0x48e   :  { %v1009_v59 = vmul.f32 %v2025_v56, %v2023_v32  ;;  %v2875_v32 = vld [vmem:[#allocation8 + $0xc4] ss:$16 sps:$4 sm:$0xff]   ;;  %v2878_v56 = vld [vmem:[#allocation8 + $0xcc] ss:$16 sps:$4 sm:$0xff]  }
 0x490   :  { %v1017_v54 = vpack.c.bf16 %v1009_v59, %v1009_v59  ;;  %v2881_v59 = vld [vmem:[#allocation8 + $0xc0] ss:$16 sps:$4 sm:$0xff]  }
 0x492   :  { %1051 = vmatmul.mubr.bf16.vlgmr.msra.gmra.mrb[32].mxu0 %v1017_v54  ;;  %1092 = vmatmul.mubr.bf16.vlgmr.msra.gmra.mrb[32].mxu1 %v1017_v54  ;;  %v2884_v54 = vld [vmem:[#allocation8 + $0xc8] ss:$16 sps:$4 sm:$0xff]  }
 0x493   :  { %1137 = vmatpush1.bf16.msra.mxu0 %v2761_v58  ;;  %1178 = vmatpush1.bf16.msra.mxu1 %v2764_v53 }
 0x494   :  { %1138 = vmatprep.subr.bf16.mxu0 %v2767_v48  ;;  %1179 = vmatprep.subr.bf16.mxu1 %v2770_v6 }
 0x495   :  { %1168 = vmatprep.mubr.bf16.mxu0 %v3022_v5  ;;  %1209 = vmatprep.mubr.bf16.mxu1 %v3022_v5 }
 0x497   :  { %1139 = vmatpush1.bf16.msra.mxu0 %v2775_v14  ;;  %1180 = vmatpush1.bf16.msra.mxu1 %v2778_v15 }
 0x498   :  { %1140 = vmatprep.subr.bf16.mxu0 %v2421_v22  ;;  %1181 = vmatprep.subr.bf16.mxu1 %v2423_v23  ;;  %v2805_v22 = vld [vmem:[#allocation8 + $0x4] ss:$16 sps:$4 sm:$0xff]   ;;  %v2808_v23 = vld [vmem:[#allocation8 + $0xc] ss:$16 sps:$4 sm:$0xff]  }
 0x49b   :  { %1141 = vmatpush1.bf16.msra.mxu0 %v2429_v25  ;;  %1182 = vmatpush1.bf16.msra.mxu1 %v2431_v26 }
 0x49c   :  { %1142 = vmatprep.subr.bf16.mxu0 %v2435_v27  ;;  %1183 = vmatprep.subr.bf16.mxu1 %v2437_v28  ;;  %v3028_v27 = vld [vmem:[#allocation22_spill] sm:$0xff] }
 0x49f   :  { %1143 = vmatpush1.bf16.msra.mxu0 %v2439_v29  ;;  %1184 = vmatpush1.bf16.msra.mxu1 %v2441_v30  ;;  %v3029_v29 = vld [vmem:[#allocation23_spill] sm:$0xff] }
 0x4a0   :  { %1144 = vmatprep.subr.bf16.mxu0 %v2447_v33  ;;  %1185 = vmatprep.subr.bf16.mxu1 %v2451_v34 }
 0x4a3   :  { %1145 = vmatpush1.bf16.msra.mxu0 %v2455_v36  ;;  %1186 = vmatpush1.bf16.msra.mxu1 %v2459_v37  ;;  %v3030_v36 = vld [vmem:[#allocation24_spill] sm:$0xff] }
 0x4a4   :  { %1146 = vmatprep.subr.bf16.mxu0 %v2463_v38  ;;  %1187 = vmatprep.subr.bf16.mxu1 %v2465_v39  ;;  %v3031_v38 = vld [vmem:[#allocation25_spill] sm:$0xff] }
 0x4a7   :  { %1147 = vmatpush1.bf16.msra.mxu0 %v2467_v40  ;;  %1188 = vmatpush1.bf16.msra.mxu1 %v2471_v41 }
 0x4a8   :  { %1148 = vmatprep.subr.bf16.mxu0 %v2475_v44  ;;  %1189 = vmatprep.subr.bf16.mxu1 %v2479_v45 }
 0x4ab   :  { %1149 = vmatpush1.bf16.msra.mxu0 %v2483_v46  ;;  %1190 = vmatpush1.bf16.msra.mxu1 %v2485_v47 }
 0x4ac   :  { %1150 = vmatprep.subr.bf16.mxu0 %v2487_v49  ;;  %1191 = vmatprep.subr.bf16.mxu1 %v2489_v50 }
 0x4af   :  { %1151 = vmatpush1.bf16.msra.mxu0 %v2495_v51  ;;  %1192 = vmatpush1.bf16.msra.mxu1 %v2497_v52 }
 0x4b0   :  { %1254 = vmatprep.subr.bf16.mxu0 %v2805_v22  ;;  %1295 = vmatprep.subr.bf16.mxu1 %v2808_v23 }
 0x565   :  { %v1052_v25 = vpop.f32.mrb[32].mxu0  ;;  %v1093_v26 = vpop.f32.mrb[32].mxu1 }
 0x566   :  { %v1100_v28 = vadd.f32 %v1052_v25, %v3028_v27  ;;  %v1102_v30 = vadd.f32 %v1093_v26, %v3029_v29  ;;  %v1054_v33 = vpop.f32.mrb[33].mxu0  ;;  %v1095_v34 = vpop.f32.mrb[33].mxu1  ;;  %v2887_v25 = vld [vmem:[#allocation8 + $0xe4] ss:$16 sps:$4 sm:$0xff]   ;;  %v2890_v26 = vld [vmem:[#allocation8 + $0xec] ss:$16 sps:$4 sm:$0xff]  }
 0x567   :  { %v1101_v37 = vadd.f32 %v1054_v33, %v3030_v36  ;;  %v1103_v39 = vadd.f32 %v1095_v34, %v3031_v38  ;;  %v1056_v40 = vpop.f32.mrb[34].mxu0  ;;  %v1097_v41 = vpop.f32.mrb[34].mxu1  ;;  %v2893_v27 = vld [vmem:[#allocation8 + $0xe0] ss:$16 sps:$4 sm:$0xff]   ;;  %v3033_v36 = vld [vmem:[#allocation27_spill] sm:$0xff] }
 0x568   :  { %v1791_v44 = vmul.f32 -1.442695, %v1100_v28  ;;  %v1057_v45 = vpop.f32.mrb[35].mxu0  ;;  %v1098_v46 = vpop.f32.mrb[35].mxu1  ;;  %v2896_v28 = vld [vmem:[#allocation8 + $0xe8] ss:$16 sps:$4 sm:$0xff]  }
 0x569   :  { %v1792_v47 = vmul.f32 -1.442695, %v1101_v37  ;;  %v1793_v49 = vmul.f32 -1.442695, %v1103_v39  ;;  %v3032_v33 = vld [vmem:[#allocation26_spill] sm:$0xff]  ;;  %v3034_v40 = vld [vmem:[#allocation28_spill] sm:$0xff] }
 0x56a   :  { %2026 = vpow2.f32 %v1791_v44  ;;  %v3035_v44 = vld [vmem:[#allocation29_spill] sm:$0xff] }
 0x56b   :  { %2028 = vpow2.f32 %v1792_v47 }
 0x56c   :  { %2030 = vpow2.f32 %v1793_v49 }
 0x56d   :  { %2032 = vtanh.f32 %v1102_v30 }
 0x574   :  { %v2027_v50 = vpop.eup %2026 }
 0x575   :  { %v2029_v51 = vpop.eup %2028  ;;  %v1107_v52 = vadd.f32 1.0, %v2027_v50 }
 0x576   :  { %v1113_v16 = vadd.f32 1.0, %v2029_v51  ;;  %v2031_v17 = vpop.eup %2030 }
 0x577   :  { %2034 = vrcp.f32 %v1107_v52  ;;  %v2033_v18 = vpop.eup %2032  ;;  %v1120_v61 = vadd.f32 1.0, %v2031_v17 }
 0x578   :  { %2036 = vrcp.f32 %v1113_v16 }
 0x579   :  { %2038 = vrcp.f32 %v1120_v61 }
 0x581   :  { %v2035_v19 = vpop.eup %2034 }
 0x582   :  { %v2037_v21 = vpop.eup %2036  ;;  %v1124_v24 = vmul.f32 %v2035_v19, %v2033_v18 }
 0x583   :  { %v1123_v60 = vmul.f32 %v2037_v21, %v2758_v57  ;;  %v2039_v1 = vpop.eup %2038  ;;  %v2872_v57 = vld [vmem:[#allocation8 + $0xa8] ss:$16 sps:$4 sm:$0xff]  }
 0x585   :  { %v2816_v62 = vadd.f32 %v1124_v24, %v1123_v60 }
 0x587   :  { %2040 = vtanh.f32 %v2816_v62 }
 0x591   :  { %v2041_v63 = vpop.eup %2040 }
 0x592   :  { %v1127_v2 = vmul.f32 %v2041_v63, %v2039_v1 }
 0x594   :  { %v1135_v0 = vpack.c.bf16 %v1127_v2, %v1127_v2 }
 0x596   :  { %1169 = vmatmul.mubr.bf16.vlgmr.msra.gmra.mrb[36].mxu0 %v1135_v0  ;;  %1210 = vmatmul.mubr.bf16.vlgmr.msra.gmra.mrb[36].mxu1 %v1135_v0 }
 0x597   :  { %1255 = vmatpush1.bf16.msra.mxu0 %v2761_v58  ;;  %1296 = vmatpush1.bf16.msra.mxu1 %v2764_v53 }
 0x598   :  { %1256 = vmatprep.subr.bf16.mxu0 %v2767_v48  ;;  %1297 = vmatprep.subr.bf16.mxu1 %v2770_v6 }
 0x599   :  { %1286 = vmatprep.mubr.bf16.mxu0 %v3022_v5  ;;  %1327 = vmatprep.mubr.bf16.mxu1 %v3022_v5 }
 0x59b   :  { %1257 = vmatpush1.bf16.msra.mxu0 %v2775_v14  ;;  %1298 = vmatpush1.bf16.msra.mxu1 %v2778_v15 }
 0x59c   :  { %1258 = vmatprep.subr.bf16.mxu0 %v2827_v3  ;;  %1299 = vmatprep.subr.bf16.mxu1 %v2830_v4 }
 0x59f   :  { %1259 = vmatpush1.bf16.msra.mxu0 %v2833_v9  ;;  %1300 = vmatpush1.bf16.msra.mxu1 %v2836_v13 }
 0x5a0   :  { %1260 = vmatprep.subr.bf16.mxu0 %v2839_v11  ;;  %1301 = vmatprep.subr.bf16.mxu1 %v2842_v55 }
 0x5a3   :  { %1261 = vmatpush1.bf16.msra.mxu0 %v2845_v7  ;;  %1302 = vmatpush1.bf16.msra.mxu1 %v2848_v10 }
 0x5a4   :  { %1262 = vmatprep.subr.bf16.mxu0 %v2851_v12  ;;  %1303 = vmatprep.subr.bf16.mxu1 %v2854_v42 }
 0x5a7   :  { %1263 = vmatpush1.bf16.msra.mxu0 %v2857_v31  ;;  %1304 = vmatpush1.bf16.msra.mxu1 %v2860_v35 }
 0x5a8   :  { %1264 = vmatprep.subr.bf16.mxu0 %v2863_v43  ;;  %1305 = vmatprep.subr.bf16.mxu1 %v2866_v20 }
 0x5ab   :  { %1265 = vmatpush1.bf16.msra.mxu0 %v2869_v8  ;;  %1306 = vmatpush1.bf16.msra.mxu1 %v2872_v57 }
 0x5ac   :  { %1266 = vmatprep.subr.bf16.mxu0 %v2875_v32  ;;  %1307 = vmatprep.subr.bf16.mxu1 %v2878_v56 }
 0x5af   :  { %1267 = vmatpush1.bf16.msra.mxu0 %v2881_v59  ;;  %1308 = vmatpush1.bf16.msra.mxu1 %v2884_v54 }
 0x5b0   :  { %1268 = vmatprep.subr.bf16.mxu0 %v2887_v25  ;;  %1309 = vmatprep.subr.bf16.mxu1 %v2890_v26 }
 0x5b3   :  { %1269 = vmatpush1.bf16.msra.mxu0 %v2893_v27  ;;  %1310 = vmatpush1.bf16.msra.mxu1 %v2896_v28 }
 0x5b4   :  { %1372 = vmatprep.subr.bf16.mxu0 %v2805_v22  ;;  %1413 = vmatprep.subr.bf16.mxu1 %v2808_v23 }
 0x669   :  { %v1170_v29 = vpop.f32.mrb[36].mxu0  ;;  %v1211_v30 = vpop.f32.mrb[36].mxu1 }
 0x66a   :  { %v1218_v34 = vadd.f32 %v1170_v29, %v3032_v33  ;;  %v1220_v37 = vadd.f32 %v1211_v30, %v3033_v36  ;;  %v1172_v38 = vpop.f32.mrb[37].mxu0  ;;  %v1213_v39 = vpop.f32.mrb[37].mxu1 }
 0x66b   :  { %v1219_v41 = vadd.f32 %v1172_v38, %v3034_v40  ;;  %v1221_v45 = vadd.f32 %v1213_v39, %v3035_v44  ;;  %v1174_v46 = vpop.f32.mrb[38].mxu0  ;;  %v1215_v47 = vpop.f32.mrb[38].mxu1  ;;  %v1946_v38 = vld [vmem:[#allocation9] sm:$0xff]   ;;  %v2274_v39 = vmov 0.0   ;;  %v1947_v40 = vld [vmem:[#allocation9 + $0x8] sm:$0xff]   ;;  %v1949_v44 = vld [vmem:[#allocation9 + $0x18] sm:$0xff]  }
 0x66c   :  { %v1794_v49 = vmul.f32 -1.442695, %v1218_v34  ;;  %v1175_v50 = vpop.f32.mrb[39].mxu0  ;;  %v1216_v51 = vpop.f32.mrb[39].mxu1  ;;  %v1951_v46 = vld [vmem:[#allocation9 + $0x28] sm:$0xff]   ;;  %v1952_v47 = vld [vmem:[#allocation9 + $0x30] sm:$0xff]  }
 0x66d   :  { %v1795_v22 = vmul.f32 -1.442695, %v1219_v41  ;;  %v1796_v23 = vmul.f32 -1.442695, %v1221_v45  ;;  %v1948_v41 = vld [vmem:[#allocation9 + $0x10] sm:$0xff]   ;;  %v1950_v45 = vld [vmem:[#allocation9 + $0x20] sm:$0xff]  }
 0x66e   :  { %2042 = vpow2.f32 %v1794_v49  ;;  %v1953_v49 = vld [vmem:[#allocation9 + $0x38] sm:$0xff]   ;;  %v1954_v50 = vld [vmem:[#allocation11] sm:$0xff]   ;;  %v1955_v51 = vld [vmem:[#allocation11 + $0x8] sm:$0xff]  }
 0x66f   :  { %2044 = vpow2.f32 %v1795_v22  ;;  %v1956_v22 = vld [vmem:[#allocation11 + $0x10] sm:$0xff]  }
 0x670   :  { %2046 = vpow2.f32 %v1796_v23  ;;  %v1957_v23 = vld [vmem:[#allocation11 + $0x18] sm:$0xff]  }
 0x671   :  { %2048 = vtanh.f32 %v1220_v37 }
 0x678   :  { %v2043_v52 = vpop.eup %2042 }
 0x679   :  { %v2045_v16 = vpop.eup %2044  ;;  %v1225_v17 = vadd.f32 1.0, %v2043_v52  ;;  %v1958_v52 = vld [vmem:[#allocation11 + $0x20] sm:$0xff]  }
 0x67a   :  { %v1231_v18 = vadd.f32 1.0, %v2045_v16  ;;  %v2047_v19 = vpop.eup %2046  ;;  %v1959_v16 = vld [vmem:[#allocation11 + $0x28] sm:$0xff]  }
 0x67b   :  { %2050 = vrcp.f32 %v1225_v17  ;;  %v2049_v21 = vpop.eup %2048  ;;  %v1238_v1 = vadd.f32 1.0, %v2047_v19  ;;  %v3040_v19 = vld [vmem:[#allocation34_spill] sm:$0xff] }
 0x67c   :  { %2052 = vrcp.f32 %v1231_v18 }
 0x67d   :  { %2054 = vrcp.f32 %v1238_v1 }
 0x685   :  { %v2051_v24 = vpop.eup %2050 }
 0x686   :  { %v2053_v61 = vpop.eup %2052  ;;  %v1242_v60 = vmul.f32 %v2051_v24, %v2049_v21  ;;  %v3041_v24 = vld [vmem:[#allocation35_spill] sm:$0xff] }
 0x687   :  { %v1241_v63 = vmul.f32 %v2053_v61, %v2816_v62  ;;  %v2055_v0 = vpop.eup %2054 }
 0x689   :  { %v2906_v2 = vadd.f32 %v1242_v60, %v1241_v63  ;;  %v3042_v63 = vld [vmem:[#allocation36_spill] sm:$0xff] }
 0x68b   :  { %2056 = vtanh.f32 %v2906_v2 }
 0x695   :  { %v2057_v29 = vpop.eup %2056 }
 0x696   :  { %v1245_v30 = vmul.f32 %v2057_v29, %v2055_v0  ;;  %v3043_v0 = vld [vmem:[#allocation37_spill] sm:$0xff] }
 0x698   :  { %v1253_v33 = vpack.c.bf16 %v1245_v30, %v1245_v30 }
 0x69a   :  { %1287 = vmatmul.mubr.bf16.vlgmr.msra.gmra.mrb[40].mxu0 %v1253_v33  ;;  %1328 = vmatmul.mubr.bf16.vlgmr.msra.gmra.mrb[40].mxu1 %v1253_v33 }
 0x69b   :  { %1373 = vmatpush1.bf16.msra.mxu0 %v2761_v58  ;;  %1414 = vmatpush1.bf16.msra.mxu1 %v2764_v53  ;;  %v3036_v53 = vld [vmem:[#allocation30_spill] sm:$0xff] }
 0x69c   :  { %1374 = vmatprep.subr.bf16.mxu0 %v2767_v48  ;;  %1415 = vmatprep.subr.bf16.mxu1 %v2770_v6  ;;  %v3037_v6 = vld [vmem:[#allocation31_spill] sm:$0xff] }
 0x69d   :  { %1404 = vmatprep.mubr.bf16.mxu0 %v3022_v5  ;;  %1445 = vmatprep.mubr.bf16.mxu1 %v3022_v5 }
 0x69f   :  { %1375 = vmatpush1.bf16.msra.mxu0 %v2775_v14  ;;  %1416 = vmatpush1.bf16.msra.mxu1 %v2778_v15 }
 0x6a0   :  { %1376 = vmatprep.subr.bf16.mxu0 %v2827_v3  ;;  %1417 = vmatprep.subr.bf16.mxu1 %v2830_v4  ;;  %v3038_v3 = vld [vmem:[#allocation32_spill] sm:$0xff] }
 0x6a3   :  { %1377 = vmatpush1.bf16.msra.mxu0 %v2833_v9  ;;  %1418 = vmatpush1.bf16.msra.mxu1 %v2836_v13  ;;  %v3039_v9 = vld [vmem:[#allocation33_spill] sm:$0xff] }
 0x6a4   :  { %1378 = vmatprep.subr.bf16.mxu0 %v2839_v11  ;;  %1419 = vmatprep.subr.bf16.mxu1 %v2842_v55 }
 0x6a7   :  { %1379 = vmatpush1.bf16.msra.mxu0 %v2845_v7  ;;  %1420 = vmatpush1.bf16.msra.mxu1 %v2848_v10 }
 0x6a8   :  { %1380 = vmatprep.subr.bf16.mxu0 %v2851_v12  ;;  %1421 = vmatprep.subr.bf16.mxu1 %v2854_v42 }
 0x6ab   :  { %1381 = vmatpush1.bf16.msra.mxu0 %v2857_v31  ;;  %1422 = vmatpush1.bf16.msra.mxu1 %v2860_v35 }
 0x6ac   :  { %1382 = vmatprep.subr.bf16.mxu0 %v2863_v43  ;;  %1423 = vmatprep.subr.bf16.mxu1 %v2866_v20 }
 0x6af   :  { %1383 = vmatpush1.bf16.msra.mxu0 %v2869_v8  ;;  %1424 = vmatpush1.bf16.msra.mxu1 %v2872_v57 }
 0x6b0   :  { %1384 = vmatprep.subr.bf16.mxu0 %v2875_v32  ;;  %1425 = vmatprep.subr.bf16.mxu1 %v2878_v56 }
 0x6b3   :  { %1385 = vmatpush1.bf16.msra.mxu0 %v2881_v59  ;;  %1426 = vmatpush1.bf16.msra.mxu1 %v2884_v54 }
 0x6b4   :  { %1386 = vmatprep.subr.bf16.mxu0 %v2887_v25  ;;  %1427 = vmatprep.subr.bf16.mxu1 %v2890_v26 }
 0x6b7   :  { %1387 = vmatpush1.bf16.msra.mxu0 %v2893_v27  ;;  %1428 = vmatpush1.bf16.msra.mxu1 %v2896_v28 }
 0x6b8   :  { %1839 = vmatprep.subr.bf16.mxu0 %v2274_v39  ;;  %1859 = vmatprep.subr.bf16.mxu1 %v2274_v39 }
 0x76d   :  { %v1288_v5 = vpop.f32.mrb[40].mxu0  ;;  %v1329_v58 = vpop.f32.mrb[40].mxu1 }
 0x76e   :  { %v1336_v48 = vadd.f32 %v1288_v5, %v3036_v53  ;;  %v1338_v14 = vadd.f32 %v1329_v58, %v3037_v6  ;;  %v1290_v15 = vpop.f32.mrb[41].mxu0  ;;  %v1331_v62 = vpop.f32.mrb[41].mxu1 }
 0x76f   :  { %v1337_v4 = vadd.f32 %v1290_v15, %v3038_v3  ;;  %v1339_v13 = vadd.f32 %v1331_v62, %v3039_v9  ;;  %v1292_v11 = vpop.f32.mrb[42].mxu0  ;;  %v1333_v55 = vpop.f32.mrb[42].mxu1 }
 0x770   :  { %v1797_v7 = vmul.f32 -1.442695, %v1336_v48  ;;  %v1293_v10 = vpop.f32.mrb[43].mxu0  ;;  %v1334_v12 = vpop.f32.mrb[43].mxu1 }
 0x771   :  { %v1798_v42 = vmul.f32 -1.442695, %v1337_v4  ;;  %v1799_v31 = vmul.f32 -1.442695, %v1339_v13 }
 0x772   :  { %2058 = vpow2.f32 %v1797_v7 }
 0x773   :  { %2060 = vpow2.f32 %v1798_v42 }
 0x774   :  { %2062 = vpow2.f32 %v1799_v31 }
 0x775   :  { %2064 = vtanh.f32 %v1338_v14 }
 0x77c   :  { %v2059_v35 = vpop.eup %2058 }
 0x77d   :  { %v2061_v43 = vpop.eup %2060  ;;  %v1343_v20 = vadd.f32 1.0, %v2059_v35 }
 0x77e   :  { %v1349_v8 = vadd.f32 1.0, %v2061_v43  ;;  %v2063_v57 = vpop.eup %2062 }
 0x77f   :  { %2066 = vrcp.f32 %v1343_v20  ;;  %v2065_v32 = vpop.eup %2064  ;;  %v1356_v25 = vadd.f32 1.0, %v2063_v57  ;;  %v1961_v57 = vld [vmem:[#allocation11 + $0x38] sm:$0xff]  }
 0x780   :  { %2068 = vrcp.f32 %v1349_v8  ;;  %v1960_v8 = vld [vmem:[#allocation11 + $0x30] sm:$0xff]  }
 0x781   :  { %2070 = vrcp.f32 %v1356_v25 }
 0x789   :  { %v2067_v56 = vpop.eup %2066 }
 0x78a   :  { %v2069_v59 = vpop.eup %2068  ;;  %v1360_v54 = vmul.f32 %v2067_v56, %v2065_v32  ;;  %v1803_v32 = vld [vmem:[%s2995_s5] ss:$0 sm:$0xff]  ;;  %s2232_s5 = scalar_lea.vmem %s1716_s26, 128 }
 0x78b   :  { %v1359_v26 = vmul.f32 %v2069_v59, %v2906_v2  ;;  %v2071_v28 = vpop.eup %2070  ;;  %p2233_p12 = scmp.ne.s32.totalorder %s1716_s26, %s2232_s5  ;;  %p2238_p0 = scmp.lt.s32.totalorder %s2232_s5, %s2232_s5 }
 0x78d   :  { %v2946_v27 = vadd.f32 %v1360_v54, %v1359_v26  ;;  %p2239_p1 = por %p2238_p0, %p2237_p13 }
 0x78f   :  { %2072 = vtanh.f32 %v2946_v27  ;;  %p2240_p2 = pnand %p2239_p1, %p2233_p12 }
 0x799   :  { %v2073_v34 = vpop.eup %2072 }
 0x79a   :  { %v1363_v36 = vmul.f32 %v2073_v34, %v2071_v28  ;;  %v1812_v34 = vld [vmem:[%s2997_s7] ss:$0 sm:$0xff] }
 0x79c   :  { %v1371_v37 = vpack.c.bf16 %v1363_v36, %v1363_v36 }
 0x79e   :  { %1405 = vmatmul.mubr.bf16.vlgmr.msra.gmra.mrb[44].mxu0 %v1371_v37  ;;  %1446 = vmatmul.mubr.bf16.vlgmr.msra.gmra.mrb[44].mxu1 %v1371_v37 }
 0x79f   :  { %1840 = vmatpush3.bf16.msra.mxu0 %v1946_v38  ;;  %1855 = vmatprep.mubr.msk.bf16.mxu0 %vm2275_vm2, %v2274_v39 }
 0x7a0   :  { %1841 = vmatprep.subr.bf16.mxu0 %v2274_v39  ;;  %1875 = vmatprep.mubr.msk.bf16.mxu1 %vm2275_vm2, %v2274_v39 }
 0x7a1   :  { %1860 = vmatpush3.bf16.msra.mxu1 %v1954_v50 }
 0x7a2   :  { %1861 = vmatprep.subr.bf16.mxu1 %v2274_v39 }
 0x7a3   :  { %1842 = vmatpush3.bf16.msra.mxu0 %v1947_v40 }
 0x7a4   :  { %1843 = vmatprep.subr.bf16.mxu0 %v2274_v39 }
 0x7a5   :  { %1862 = vmatpush3.bf16.msra.mxu1 %v1955_v51 }
 0x7a6   :  { %1863 = vmatprep.subr.bf16.mxu1 %v2274_v39 }
 0x7a7   :  { %1844 = vmatpush3.bf16.msra.mxu0 %v1948_v41 }
 0x7a8   :  { %1845 = vmatprep.subr.bf16.mxu0 %v2274_v39 }
 0x7a9   :  { %1864 = vmatpush3.bf16.msra.mxu1 %v1956_v22 }
 0x7aa   :  { %1865 = vmatprep.subr.bf16.mxu1 %v2274_v39 }
 0x7ab   :  { %1846 = vmatpush3.bf16.msra.mxu0 %v1949_v44 }
 0x7ac   :  { %1847 = vmatprep.subr.bf16.mxu0 %v2274_v39 }
 0x7ad   :  { %1866 = vmatpush3.bf16.msra.mxu1 %v1957_v23 }
 0x7ae   :  { %1867 = vmatprep.subr.bf16.mxu1 %v2274_v39 }
 0x7af   :  { %1848 = vmatpush3.bf16.msra.mxu0 %v1950_v45 }
 0x7b0   :  { %1849 = vmatprep.subr.bf16.mxu0 %v2274_v39 }
 0x7b1   :  { %1868 = vmatpush3.bf16.msra.mxu1 %v1958_v52 }
 0x7b2   :  { %1869 = vmatprep.subr.bf16.mxu1 %v2274_v39 }
 0x7b3   :  { %1850 = vmatpush3.bf16.msra.mxu0 %v1951_v46 }
 0x7b4   :  { %1851 = vmatprep.subr.bf16.mxu0 %v2274_v39 }
 0x7b5   :  { %1870 = vmatpush3.bf16.msra.mxu1 %v1959_v16 }
 0x7b6   :  { %1871 = vmatprep.subr.bf16.mxu1 %v2274_v39 }
 0x7b7   :  { %1852 = vmatpush3.bf16.msra.mxu0 %v1952_v47 }
 0x7b8   :  { %1853 = vmatprep.subr.bf16.mxu0 %v2274_v39 }
 0x7b9   :  { %1872 = vmatpush3.bf16.msra.mxu1 %v1960_v8 }
 0x7ba   :  { %1873 = vmatprep.subr.bf16.mxu1 %v2274_v39 }
 0x7bb   :  { %1854 = vmatpush3.bf16.msra.mxu0 %v1953_v49 }
 0x7bd   :  { %1874 = vmatpush3.bf16.msra.mxu1 %v1961_v57 }
 0x871   :  { %v1406_v17 = vpop.f32.mrb[44].mxu0  ;;  %v1447_v18 = vpop.f32.mrb[44].mxu1 }
 0x872   :  { %v1454_v21 = vadd.f32 %v1406_v17, %v3040_v19  ;;  %v1456_v61 = vadd.f32 %v1447_v18, %v3041_v24  ;;  %v1408_v60 = vpop.f32.mrb[45].mxu0  ;;  %v1449_v1 = vpop.f32.mrb[45].mxu1 }
 0x873   :  { %v1455_v2 = vadd.f32 %v1408_v60, %v3042_v63  ;;  %v1457_v29 = vadd.f32 %v1449_v1, %v3043_v0  ;;  %v1410_v30 = vpop.f32.mrb[46].mxu0  ;;  %v1451_v33 = vpop.f32.mrb[46].mxu1 }
 0x874   :  { %v1800_v5 = vmul.f32 -1.442695, %v1454_v21  ;;  %v1411_v58 = vpop.f32.mrb[47].mxu0  ;;  %v1452_v53 = vpop.f32.mrb[47].mxu1 }
 0x875   :  { %v1801_v48 = vmul.f32 -1.442695, %v1455_v2  ;;  %v1802_v6 = vmul.f32 -1.442695, %v1457_v29 }
 0x876   :  { %2074 = vpow2.f32 %v1800_v5 }
 0x877   :  { %2076 = vpow2.f32 %v1801_v48 }
 0x878   :  { %2078 = vpow2.f32 %v1802_v6 }
 0x879   :  { %2080 = vtanh.f32 %v1456_v61 }
 0x880   :  { %v2075_v14 = vpop.eup %2074 }
 0x881   :  { %v2077_v15 = vpop.eup %2076  ;;  %v1461_v62 = vadd.f32 1.0, %v2075_v14 }
 0x882   :  { %v1467_v3 = vadd.f32 1.0, %v2077_v15  ;;  %v2079_v4 = vpop.eup %2078 }
 0x883   :  { %2082 = vrcp.f32 %v1461_v62  ;;  %v2081_v9 = vpop.eup %2080  ;;  %v1474_v7 = vadd.f32 1.0, %v2079_v4 }
 0x884   :  { %2084 = vrcp.f32 %v1467_v3 }
 0x885   :  { %2086 = vrcp.f32 %v1474_v7 }
 0x88d   :  { %v2083_v13 = vpop.eup %2082 }
 0x88e   :  { %v2085_v11 = vpop.eup %2084  ;;  %v1478_v55 = vmul.f32 %v2083_v13, %v2081_v9 }
 0x88f   :  { %v1477_v10 = vmul.f32 %v2085_v11, %v2946_v27  ;;  %v2087_v42 = vpop.eup %2086 }
 0x891   :  { %v1479_v12 = vadd.f32 %v1478_v55, %v1477_v10 }
 0x893   :  { %2088 = vtanh.f32 %v1479_v12 }
 0x89d   :  { %v2089_v31 = vpop.eup %2088 }
 0x89e   :  { %v1481_v35 = vmul.f32 %v2089_v31, %v2087_v42 }
 0x8a0   :  { %v1482_v43 = vmax.f32 %v1481_v35, 0.0 }
 0x8a2   :  { %v1483_v20 = vpack.c.bf16 %v1482_v43, %v1482_v43 }
 0x8a4   :  { %1856 = vmatmul.mubr.bf16.vlgmr.msra.gmra.mrb[48].mxu0 %v1483_v20 }
 0x977   :  { %v1589_v56 = vpop.f32.mrb[48].mxu0 }
 0x978   :  { %v1590_v59 = vadd.f32 %v1803_v32, %v1589_v56  ;;  %v1857_v54 = vpop.f32.mrb[49].mxu0 }
 0x979   :  { %v1592_v25 = vpop.f32.mrb[50].mxu0 }
 0x97a   :  { %v1595_v26 = vmax.f32 %v1590_v59, 0.0  ;;  %v1858_v27 = vpop.f32.mrb[51].mxu0 }
 0x97c   :  { %v1596_v28 = vpack.c.bf16 %v1595_v26, %v1595_v26 }
 0x97e   :  { %1876 = vmatmul.mubr.bf16.vlgmr.msra.gmra.mrb[48].mxu1 %v1596_v28 }
 0xa51   :  { %v1702_v36 = vpop.f32.mrb[48].mxu1 }
 0xa52   :  { %v1703_v37 = vadd.f32 %v1812_v34, %v1702_v36  ;;  %v1877_v38 = vpop.f32.mrb[49].mxu1 }
 0xa53   :  { %v1705_v39 = vpop.f32.mrb[50].mxu1 }
 0xa54   :  { %1708 = vst [vmem:[#allocation12] sm:$0xff] %v1703_v37  ;;  %v1878_v40 = vpop.f32.mrb[51].mxu1 }
 0xa55   :  { %2243 = shalt.err (!%p2240_p2)
}
 0xa56   :  { %s2244_s7 = scalar_lea.hbm %s2998_s8, 128 }
 0xa57   :  { %p2245_p3 = scmp.ne.s32.totalorder %s2998_s8, %s2244_s7  ;;  %p2248_p4 = scmp.lt.u32.totalorder %s2244_s7, %s2998_s8 }
 0xa59   :  { %p2250_p5 = pnand %p2248_p4, %p2245_p3 }
 0xa5b   :  { %2253 = shalt.err (!%p2250_p5)
}
 0xa5c   :  { %1718 = dma.vmem_to_hbm [thread:$0]  %s1716_s26, 128, %s2998_s8, [#allocation5]  }
 0xa5d   :  { %2260 = dma.done.wait [#allocation5], 128  }
 0xa5e   :  { %2261 = vsyncadd [#allocation5], 4294967168 }
 0xa5f   :  { %1722 = vsyncpa [#allocation4], 1 }
 0xa60   :  { %1723 = vsyncpa [#allocation7], 1 }
 0xa61   :  { %1724 = vsyncpa [#allocation10], 1 }
 0xa62   :  { %1725 = vsyncpa [#allocation5], 1 }

</bundles_post_ra>
